<compile_context>
chip_gen: v5e
topology: v5e:2x2
jax: 0.10.0
libtpu: 0.0.40
codegen_flags: <defaults>
</compile_context>

<pallas_src>
import math
from functools import partial

import jax
import jax.numpy as jnp
from jax import lax
from jax.experimental import pallas as pl
from jax.experimental.pallas import tpu as pltpu


def _round_up(a, b):
    return ((a + b - 1) // b) * b


# ----------------------------- Pallas kernels ------------------------------

def _gate_kernel(x_ref, w_ref, o_ref):
    # Router logits: x (TR, H) @ gate_w (E_pad, H)^T -> (TR, E_pad), f32 acc.
    o_ref[...] = lax.dot_general(
        x_ref[...], w_ref[...],
        dimension_numbers=(((1,), (1,)), ((), ())),
        preferred_element_type=jnp.float32)


def _grouped_mlp_kernel(tile_e_ref, tile_n_ref,
                        x_ref, rw_ref, wg_ref, wu_ref, wd_ref, o_ref):
    """One grid step = one (TM, H) tile of tokens routed to ONE expert.

    Tokens were sorted/compacted by expert in XLA.  Consecutive tiles of the
    same expert reuse the resident weight blocks (same block index -> no
    re-DMA), so each expert's weights are fetched from HBM at most once per
    core and padding tiles beyond the routed work are skipped entirely.
    """
    g = pl.program_id(0)
    n_valid = tile_n_ref[g]

    @pl.when(n_valid > 0)
    def _():
        x = x_ref[...]                                        # (TM, H)
        # x @ W^T, contracting the last dims of both operands (NT form).
        gm = lax.dot_general(x, wg_ref[...],
                             dimension_numbers=(((1,), (1,)), ((), ())),
                             preferred_element_type=jnp.float32)   # (TM, I)
        um = lax.dot_general(x, wu_ref[...],
                             dimension_numbers=(((1,), (1,)), ((), ())),
                             preferred_element_type=jnp.float32)   # (TM, I)
        h = (gm * jax.nn.sigmoid(gm)) * um                    # SiLU(g) * u, f32

        # Per-row routing weight (padding rows carry weight 0); scaling the
        # (TM, I) intermediate is cheaper than scaling the (TM, H) output.
        h = (h * rw_ref[...].astype(jnp.float32)).astype(x.dtype)

        o_ref[...] = lax.dot_general(
            h, wd_ref[...],
            dimension_numbers=(((1,), (1,)), ((), ())),
            preferred_element_type=jnp.float32).astype(o_ref.dtype)

    @pl.when(n_valid == 0)
    def _():
        # Tile beyond the routed work: keep the (never gathered) output rows
        # deterministic.
        o_ref[...] = jnp.zeros_like(o_ref)


# ------------------------------ JAX wrapper --------------------------------

@partial(jax.jit, static_argnames=("num_selected", "norm_topk_prob", "tile_m"))
def qwen3_moe_fused_block(hidden_states, gate_w, wg, wu, wd,
                          num_selected=2, norm_topk_prob=True, tile_m=None):
    B, S, H = hidden_states.shape
    E, I, _ = wg.shape
    K = num_selected
    M = B * S
    N = M * K                                   # total (token, slot) assignments
    dtype = hidden_states.dtype
    itemsize = jnp.dtype(dtype).itemsize

    x2d = hidden_states.reshape(M, H)

    # ------------------------------ router --------------------------------
    TR = min(128, _round_up(M, 8))
    M_pad = _round_up(M, TR)
    E_pad = _round_up(E, 128)                   # lane-dense logit stores
    x_r = jnp.pad(x2d, ((0, M_pad - M), (0, 0)))
    gate_w_pad = jnp.pad(gate_w, ((0, E_pad - E), (0, 0))).astype(dtype)

    logits_pad = pl.pallas_call(
        _gate_kernel,
        out_shape=jax.ShapeDtypeStruct((M_pad, E_pad), jnp.float32),
        grid=(M_pad // TR,),
        in_specs=[
            pl.BlockSpec((TR, H), lambda i: (i, 0)),
            pl.BlockSpec((E_pad, H), lambda i: (0, 0)),
        ],
        out_specs=pl.BlockSpec((TR, E_pad), lambda i: (i, 0)),
        compiler_params=pltpu.CompilerParams(
            dimension_semantics=("parallel",)),
    )(x_r, gate_w_pad)

    router_logits = logits_pad[:M, :E].astype(dtype)

    # softmax -> top-k -> (optional) renormalize, f32 routing math.
    probs = jax.nn.softmax(router_logits.astype(jnp.float32), axis=-1)
    top_w, top_i = lax.top_k(probs, K)
    if norm_topk_prob:
        top_w = top_w / jnp.sum(top_w, axis=-1, keepdims=True)
    top_w = top_w.astype(dtype)

    # ------------------ grouped-GEMM schedule (XLA side) ------------------
    # Token tile for the expert GEMM.  In the grouped formulation the weight
    # traffic is independent of TM (each expert's weights are loaded at most
    # once), so TM only trades per-expert padding FLOPs against grid-step
    # overhead / MXU utilisation; 256 matches the v6e/v7x MXU width.
    if tile_m is not None:
        TM = max(8, _round_up(min(tile_m, max(N, 8)), 8))
    else:
        TM = 256 if N >= 256 else max(8, _round_up(N, 8))
    # Worst case: every active expert leaves one partially filled tile.
    G_max = (N + TM - 1) // TM + min(E, N)
    R = G_max * TM                              # padded grouped rows

    flat_e = top_i.reshape(N).astype(jnp.int32)
    flat_w = top_w.reshape(N)
    flat_tok = jnp.arange(N, dtype=jnp.int32) // K

    sort_idx = jnp.argsort(flat_e)              # sorted-by-expert order
    sorted_e = flat_e[sort_idx]
    sorted_tok = flat_tok[sort_idx]
    sorted_w = flat_w[sort_idx]

    counts = jnp.zeros((E,), jnp.int32).at[flat_e].add(1)         # (E,)
    csum = jnp.cumsum(counts)
    c_off = (csum - counts).astype(jnp.int32)                     # excl. cumsum

    tiles_per_e = (counts + TM - 1) // TM                         # (E,)
    incl_tiles = jnp.cumsum(tiles_per_e).astype(jnp.int32)
    t_off = (incl_tiles - tiles_per_e).astype(jnp.int32)

    # Per-tile metadata (1-D int32 -> cheap SMEM).  tile_expert is
    # non-decreasing and clamped for unused tiles, so the weight block index
    # never moves backwards and unused tiles trigger no new weight DMA.
    g_ids = jnp.arange(G_max, dtype=jnp.int32)
    tile_expert = jnp.clip(
        jnp.searchsorted(incl_tiles, g_ids, side="right"), 0, E - 1
    ).astype(jnp.int32)
    rows_before = (g_ids - t_off[tile_expert]) * TM
    tile_nrows = jnp.clip(counts[tile_expert] - rows_before, 0, TM
                          ).astype(jnp.int32)

    # Map each padded row to its (sorted) assignment; pad rows get weight 0.
    r_ids = jnp.arange(R, dtype=jnp.int32)
    r_tile = r_ids // TM
    r_j = r_ids % TM
    r_e = tile_expert[r_tile]
    r_rank = (r_tile - t_off[r_e]) * TM + r_j
    r_valid = (r_rank >= 0) & (r_rank < counts[r_e])
    r_a = jnp.clip(c_off[r_e] + r_rank, 0, N - 1)
    row_tok = jnp.where(r_valid, sorted_tok[r_a], 0)
    row_w = jnp.where(r_valid, sorted_w[r_a], jnp.zeros((), dtype))

    x_grouped = x2d[row_tok]                                      # (R, H)
    rw_grouped = row_w.reshape(R, 1)

    # Padded destination row of every assignment (for the final combine).
    a_ids = jnp.arange(N, dtype=jnp.int32)
    a_rank = a_ids - c_off[sorted_e]
    a_pos = (t_off[sorted_e] + a_rank // TM) * TM + a_rank % TM   # (N,)
    inv_sort = jnp.argsort(sort_idx)                              # flat -> sorted pos
    gather_pos = a_pos[inv_sort]                                  # original order

    # ------------------------- expert grouped GEMM ------------------------
    wg_c = wg.astype(dtype)
    wu_c = wu.astype(dtype)
    wd_c = wd.astype(dtype)

    # VMEM: double-buffered {x tile, rw column, one expert's 3 weights, out}
    # + f32 temporaries for the gate/up intermediates + slack.
    w_bytes = 3 * I * H * itemsize
    io_bytes = (2 * TM * H + TM) * itemsize
    vmem_need = 2 * (w_bytes + io_bytes) + 3 * TM * I * 4 + (2 << 20)
    try:
        vmem_cap = int(getattr(pltpu.get_tpu_info(), "vmem_capacity_bytes",
                               64 << 20))
    except Exception:
        vmem_cap = 64 << 20
    vmem_limit = int(min(max(vmem_need, 16 << 20), vmem_cap * 3 // 4))

    out_grouped = pl.pallas_call(
        _grouped_mlp_kernel,
        out_shape=jax.ShapeDtypeStruct((R, H), dtype),
        grid_spec=pltpu.PrefetchScalarGridSpec(
            num_scalar_prefetch=2,
            grid=(G_max,),
            in_specs=[
                pl.BlockSpec((TM, H), lambda g, te, tn: (g, 0)),     # tokens
                pl.BlockSpec((TM, 1), lambda g, te, tn: (g, 0)),     # row weights
                pl.BlockSpec((None, I, H), lambda g, te, tn: (te[g], 0, 0)),
                pl.BlockSpec((None, I, H), lambda g, te, tn: (te[g], 0, 0)),
                pl.BlockSpec((None, H, I), lambda g, te, tn: (te[g], 0, 0)),
            ],
            out_specs=pl.BlockSpec((TM, H), lambda g, te, tn: (g, 0)),
        ),
        compiler_params=pltpu.CompilerParams(
            dimension_semantics=("parallel",),
            vmem_limit_bytes=vmem_limit),
    )(tile_expert, tile_nrows, x_grouped, rw_grouped, wg_c, wu_c, wd_c)

    # Un-group: gather each assignment's output row (weights already applied
    # in-kernel) and sum over the top-k slots.  No scatter needed.
    y = out_grouped[gather_pos]                                   # (N, H)
    out2d = jnp.sum(y.reshape(M, K, H), axis=1).astype(dtype)

    return out2d.reshape(B, S, H), router_logits


# ----------------------- deterministic parameter init ----------------------

def moe_fused_kaiming_uniform(key, shape):
    # bound = sqrt(3 * 5 / in_features), in_features = shape[-1]
    bound = math.sqrt(3.0 * 5.0 / shape[-1])
    return jax.random.uniform(key, shape, jnp.float32, -bound, bound)


def linear_default_init(key, shape):
    # nn.Linear default: uniform(-1/sqrt(fan_in), 1/sqrt(fan_in))
    bound = 1.0 / math.sqrt(shape[-1])
    return jax.random.uniform(key, shape, jnp.float32, -bound, bound)


# --------------------------------- main -------------------------------------

if __name__ == "__main__":
    # Keep the pure-JAX reference in full f32 so the tolerance check is tight.
    jax.config.update("jax_default_matmul_precision", "highest")

    hidden_size = 64
    moe_intermediate_size = 128
    num_experts = 8
    num_experts_per_tok = 2
    norm_topk_prob = True

    key = jax.random.PRNGKey(0)
    k_x1, k_x2, k_g, k_wg, k_wu, k_wd = jax.random.split(key, 6)

    gate_w = linear_default_init(k_g, (num_experts, hidden_size))
    wg = moe_fused_kaiming_uniform(
        k_wg, (num_experts, moe_intermediate_size, hidden_size))
    wu = moe_fused_kaiming_uniform(
        k_wu, (num_experts, moe_intermediate_size, hidden_size))
    wd = moe_fused_kaiming_uniform(
        k_wd, (num_experts, hidden_size, moe_intermediate_size))

    # Pure-JAX reference (dense formulation — mathematically identical to the
    # sorted grouped-GEMM formulation of the PyTorch module).
    def reference(hs):
        B, S, H = hs.shape
        M = B * S
        x = hs.reshape(M, H)
        logits = x @ gate_w.T
        probs = jax.nn.softmax(logits.astype(jnp.float32), axis=-1)
        tw, ti = lax.top_k(probs, num_experts_per_tok)
        if norm_topk_prob:
            tw = tw / jnp.sum(tw, axis=-1, keepdims=True)
        tw = tw.astype(hs.dtype)
        dense = jnp.zeros((M, num_experts), jnp.float32)
        dense = dense.at[jnp.arange(M)[:, None], ti].set(tw.astype(jnp.float32))
        acc = jnp.zeros((M, H), jnp.float32)
        for e in range(num_experts):
            g = x @ wg[e].T
            u = x @ wu[e].T
            h = jax.nn.silu(g) * u
            acc = acc + dense[:, e:e + 1] * (h @ wd[e].T)
        return acc.astype(hs.dtype).reshape(B, S, H), logits.astype(hs.dtype)

    # --- Test 1: small config (single tile per expert). ---
    hs1 = jax.random.normal(k_x1, (2, 8, hidden_size), jnp.float32)
    out1, logits1 = qwen3_moe_fused_block(
        hs1, gate_w, wg, wu, wd,
        num_selected=num_experts_per_tok, norm_topk_prob=norm_topk_prob)
    out1 = jax.block_until_ready(out1)
    ref1, rlog1 = reference(hs1)
    assert jnp.allclose(out1, ref1, atol=2e-4, rtol=2e-4), "output mismatch (t1)"
    assert jnp.allclose(logits1, rlog1, atol=2e-4, rtol=2e-4), \
        "router logits mismatch (t1)"

    # --- Test 2: multi-tile-per-expert schedule path (forced small tile). ---
    hs2 = jax.random.normal(k_x2, (2, 64, hidden_size), jnp.float32)
    out2, logits2 = qwen3_moe_fused_block(
        hs2, gate_w, wg, wu, wd,
        num_selected=num_experts_per_tok, norm_topk_prob=norm_topk_prob,
        tile_m=16)
    out2 = jax.block_until_ready(out2)
    ref2, rlog2 = reference(hs2)
    assert jnp.allclose(out2, ref2, atol=2e-4, rtol=2e-4), "output mismatch (t2)"
    assert jnp.allclose(logits2, rlog2, atol=2e-4, rtol=2e-4), \
        "router logits mismatch (t2)"

    print("KERNEL_OK")
</pallas_src>

<mosaic_0001>
module attributes {stable_mosaic.version = 11 : i64} {
  func.func @_gate_kernel(%arg0: i32, %arg1: memref<16x64xf32, #tpu.memory_space<vmem>>, %arg2: memref<128x64xf32, #tpu.memory_space<vmem>>, %arg3: memref<16x128xf32, #tpu.memory_space<vmem>>) attributes {dimension_semantics = [#tpu.dimension_semantics<parallel>], iteration_bounds = array<i64: 1>, scalar_prefetch = 0 : i64, scratch_operands = 0 : i64, tpu.core_type = #tpu.core_type<tc>, window_params = [{transform_indices = @transform_0, window_bounds = array<i64: 16, 64>}, {pipeline_mode = #tpu.pipeline_mode<synchronous>, transform_indices = @transform_1, window_bounds = array<i64: 128, 64>}, {transform_indices = @transform_2, window_bounds = array<i64: 16, 128>}]} {
    %c0 = arith.constant 0 : index
    %c0_0 = arith.constant 0 : index
    %0 = vector.load %arg1[%c0, %c0_0] : memref<16x64xf32, #tpu.memory_space<vmem>>, vector<16x64xf32>
    %c0_1 = arith.constant 0 : index
    %c0_2 = arith.constant 0 : index
    %1 = vector.load %arg2[%c0_1, %c0_2] : memref<128x64xf32, #tpu.memory_space<vmem>>, vector<128x64xf32>
    %cst = arith.constant dense<0.000000e+00> : vector<16x128xf32>
    %2 = tpu.matmul %0, %1, %cst {dimension_numbers = #tpu.dot_dimension_numbers<[1], [1], [0], [0], [0, 0, 1, 0], [], []>, precision = #tpu.contract_precision<fp32>} : vector<16x64xf32>, vector<128x64xf32>, vector<16x128xf32> -> vector<16x128xf32>
    %c0_3 = arith.constant 0 : index
    %c0_4 = arith.constant 0 : index
    %3 = vector.load %arg3[%c0_3, %c0_4] : memref<16x128xf32, #tpu.memory_space<vmem>>, vector<16x128xf32>
    tpu.vector_store %arg3[%c0_3, %c0_4], %2 {strides = array<i32>} : memref<16x128xf32, #tpu.memory_space<vmem>>, vector<16x128xf32>,
    return
  }
  func.func @transform_0(%arg0: i32) -> (i32, i32) {
    %c0_i32 = arith.constant 0 : i32
    %c0_i32_0 = arith.constant 0 : i32
    return %arg0, %c0_i32 : i32, i32
  }
  func.func @transform_1(%arg0: i32) -> (i32, i32) {
    %c0_i32 = arith.constant 0 : i32
    %c0_i32_0 = arith.constant 0 : i32
    %c0_i32_1 = arith.constant 0 : i32
    return %c0_i32, %c0_i32_0 : i32, i32
  }
  func.func @transform_2(%arg0: i32) -> (i32, i32) {
    %c0_i32 = arith.constant 0 : i32
    %c0_i32_0 = arith.constant 0 : i32
    return %arg0, %c0_i32 : i32, i32
  }
}

module attributes {stable_mosaic.version = 11 : i64} {
  func.func @_grouped_mlp_kernel(%arg0: i32, %arg1: memref<9xi32, #tpu.memory_space<smem>>, %arg2: memref<9xi32, #tpu.memory_space<smem>>, %arg3: memref<32x64xf32, #tpu.memory_space<vmem>>, %arg4: memref<32x1xf32, #tpu.memory_space<vmem>>, %arg5: memref<1x128x64xf32, #tpu.memory_space<vmem>>, %arg6: memref<1x128x64xf32, #tpu.memory_space<vmem>>, %arg7: memref<1x64x128xf32, #tpu.memory_space<vmem>>, %arg8: memref<32x64xf32, #tpu.memory_space<vmem>>) attributes {dimension_semantics = [#tpu.dimension_semantics<parallel>], iteration_bounds = array<i64: 9>, scalar_prefetch = 2 : i64, scratch_operands = 0 : i64, tpu.core_type = #tpu.core_type<tc>, window_params = [{transform_indices = @transform_0, window_bounds = array<i64: 32, 64>}, {transform_indices = @transform_1, window_bounds = array<i64: 32, 1>}, {transform_indices = @transform_2, window_bounds = array<i64: 1, 128, 64>}, {transform_indices = @transform_3, window_bounds = array<i64: 1, 128, 64>}, {transform_indices = @transform_4, window_bounds = array<i64: 1, 64, 128>}, {transform_indices = @transform_5, window_bounds = array<i64: 32, 64>}]} {
    %0 = arith.index_cast %arg0 : i32 to index
    %1 = memref.load %arg2[%0] : memref<9xi32, #tpu.memory_space<smem>>
    %c0_i32 = arith.constant 0 : i32
    %2 = arith.cmpi sgt, %1, %c0_i32 : i32
    %3 = arith.extui %2 : i1 to i32
    %c0_i32_0 = arith.constant 0 : i32
    %4 = arith.cmpi ne, %3, %c0_i32_0 : i32
    scf.if %4 {
      %c0 = arith.constant 0 : index
      %c0_3 = arith.constant 0 : index
      %8 = vector.load %arg3[%c0, %c0_3] : memref<32x64xf32, #tpu.memory_space<vmem>>, vector<32x64xf32>
      %c0_4 = arith.constant 0 : index
      %c0_5 = arith.constant 0 : index
      %c0_6 = arith.constant 0 : index
      %9 = vector.load %arg5[%c0_4, %c0_5, %c0_6] : memref<1x128x64xf32, #tpu.memory_space<vmem>>, vector<1x128x64xf32>
      %10 = vector.shape_cast %9 : vector<1x128x64xf32> to vector<128x64xf32>
      %cst = arith.constant dense<0.000000e+00> : vector<32x128xf32>
      %11 = tpu.matmul %8, %10, %cst {dimension_numbers = #tpu.dot_dimension_numbers<[1], [1], [0], [0], [0, 0, 1, 0], [], []>, precision = #tpu.contract_precision<fp32>} : vector<32x64xf32>, vector<128x64xf32>, vector<32x128xf32> -> vector<32x128xf32>
      %c0_7 = arith.constant 0 : index
      %c0_8 = arith.constant 0 : index
      %c0_9 = arith.constant 0 : index
      %12 = vector.load %arg6[%c0_7, %c0_8, %c0_9] : memref<1x128x64xf32, #tpu.memory_space<vmem>>, vector<1x128x64xf32>
      %13 = vector.shape_cast %12 : vector<1x128x64xf32> to vector<128x64xf32>
      %cst_10 = arith.constant dense<0.000000e+00> : vector<32x128xf32>
      %14 = tpu.matmul %8, %13, %cst_10 {dimension_numbers = #tpu.dot_dimension_numbers<[1], [1], [0], [0], [0, 0, 1, 0], [], []>, precision = #tpu.contract_precision<fp32>} : vector<32x64xf32>, vector<128x64xf32>, vector<32x128xf32> -> vector<32x128xf32>
      %15 = arith.negf %11 : vector<32x128xf32>
      %16 = math.exp %15 : vector<32x128xf32>
      %cst_11 = arith.constant 1.000000e+00 : f32
      %17 = vector.broadcast %cst_11 : f32 to vector<32x128xf32>
      %18 = arith.addf %17, %16 : vector<32x128xf32>
      %19 = arith.divf %17, %18 : vector<32x128xf32>
      %20 = arith.mulf %11, %19 : vector<32x128xf32>
      %21 = arith.mulf %20, %14 : vector<32x128xf32>
      %c0_12 = arith.constant 0 : index
      %c0_13 = arith.constant 0 : index
      %22 = vector.load %arg4[%c0_12, %c0_13] : memref<32x1xf32, #tpu.memory_space<vmem>>, vector<32x1xf32>
      %23 = vector.broadcast %22 : vector<32x1xf32> to vector<32x128xf32>
      %24 = arith.mulf %21, %23 : vector<32x128xf32>
      %c0_14 = arith.constant 0 : index
      %c0_15 = arith.constant 0 : index
      %c0_16 = arith.constant 0 : index
      %25 = vector.load %arg7[%c0_14, %c0_15, %c0_16] : memref<1x64x128xf32, #tpu.memory_space<vmem>>, vector<1x64x128xf32>
      %26 = vector.shape_cast %25 : vector<1x64x128xf32> to vector<64x128xf32>
      %cst_17 = arith.constant dense<0.000000e+00> : vector<32x64xf32>
      %27 = tpu.matmul %24, %26, %cst_17 {dimension_numbers = #tpu.dot_dimension_numbers<[1], [1], [0], [0], [0, 0, 1, 0], [], []>, precision = #tpu.contract_precision<fp32>} : vector<32x128xf32>, vector<64x128xf32>, vector<32x64xf32> -> vector<32x64xf32>
      %c0_18 = arith.constant 0 : index
      %c0_19 = arith.constant 0 : index
      %28 = vector.load %arg8[%c0_18, %c0_19] : memref<32x64xf32, #tpu.memory_space<vmem>>, vector<32x64xf32>
      tpu.vector_store %arg8[%c0_18, %c0_19], %27 {strides = array<i32>} : memref<32x64xf32, #tpu.memory_space<vmem>>, vector<32x64xf32>,
    } else {
    }
    %c0_i32_1 = arith.constant 0 : i32
    %5 = arith.cmpi eq, %1, %c0_i32_1 : i32
    %6 = arith.extui %5 : i1 to i32
    %c0_i32_2 = arith.constant 0 : i32
    %7 = arith.cmpi ne, %6, %c0_i32_2 : i32
    scf.if %7 {
      %cst = arith.constant 0.000000e+00 : f32
      %8 = vector.broadcast %cst : f32 to vector<32x64xf32>
      %c0 = arith.constant 0 : index
      %c0_3 = arith.constant 0 : index
      %9 = vector.load %arg8[%c0, %c0_3] : memref<32x64xf32, #tpu.memory_space<vmem>>, vector<32x64xf32>
      tpu.vector_store %arg8[%c0, %c0_3], %8 {strides = array<i32>} : memref<32x64xf32, #tpu.memory_space<vmem>>, vector<32x64xf32>,
    } else {
    }
    return
  }
  func.func @transform_0(%arg0: i32, %arg1: memref<9xi32, #tpu.memory_space<smem>>, %arg2: memref<9xi32, #tpu.memory_space<smem>>) -> (i32, i32) {
    %c0_i32 = arith.constant 0 : i32
    %c0_i32_0 = arith.constant 0 : i32
    return %arg0, %c0_i32 : i32, i32
  }
  func.func @transform_1(%arg0: i32, %arg1: memref<9xi32, #tpu.memory_space<smem>>, %arg2: memref<9xi32, #tpu.memory_space<smem>>) -> (i32, i32) {
    %c0_i32 = arith.constant 0 : i32
    %c0_i32_0 = arith.constant 0 : i32
    return %arg0, %c0_i32 : i32, i32
  }
  func.func @transform_2(%arg0: i32, %arg1: memref<9xi32, #tpu.memory_space<smem>>, %arg2: memref<9xi32, #tpu.memory_space<smem>>) -> (i32, i32, i32) {
    %0 = arith.index_cast %arg0 : i32 to index
    %1 = memref.load %arg1[%0] : memref<9xi32, #tpu.memory_space<smem>>
    %c0_i32 = arith.constant 0 : i32
    %c0_i32_0 = arith.constant 0 : i32
    %c0_i32_1 = arith.constant 0 : i32
    return %1, %c0_i32, %c0_i32_0 : i32, i32, i32
  }
  func.func @transform_3(%arg0: i32, %arg1: memref<9xi32, #tpu.memory_space<smem>>, %arg2: memref<9xi32, #tpu.memory_space<smem>>) -> (i32, i32, i32) {
    %0 = arith.index_cast %arg0 : i32 to index
    %1 = memref.load %arg1[%0] : memref<9xi32, #tpu.memory_space<smem>>
    %c0_i32 = arith.constant 0 : i32
    %c0_i32_0 = arith.constant 0 : i32
    %c0_i32_1 = arith.constant 0 : i32
    return %1, %c0_i32, %c0_i32_0 : i32, i32, i32
  }
  func.func @transform_4(%arg0: i32, %arg1: memref<9xi32, #tpu.memory_space<smem>>, %arg2: memref<9xi32, #tpu.memory_space<smem>>) -> (i32, i32, i32) {
    %0 = arith.index_cast %arg0 : i32 to index
    %1 = memref.load %arg1[%0] : memref<9xi32, #tpu.memory_space<smem>>
    %c0_i32 = arith.constant 0 : i32
    %c0_i32_0 = arith.constant 0 : i32
    %c0_i32_1 = arith.constant 0 : i32
    return %1, %c0_i32, %c0_i32_0 : i32, i32, i32
  }
  func.func @transform_5(%arg0: i32, %arg1: memref<9xi32, #tpu.memory_space<smem>>, %arg2: memref<9xi32, #tpu.memory_space<smem>>) -> (i32, i32) {
    %c0_i32 = arith.constant 0 : i32
    %c0_i32_0 = arith.constant 0 : i32
    return %arg0, %c0_i32 : i32, i32
  }
}

</mosaic_0001>

<bundles_post_ra>
// kernel: custom-call.1
= control target key start
LH: loop header
LB: loop body
LE: loop exit
PB: predicated region body
PF: predicated region fallthrough
CT: control target
= control target key end

     0   :  { %s6_s0 = inlined_call_operand.vmem [shape: u32[9], index: 0, kind: output, shape index: {}]  }

// kernel: qwen3_moe_fused_block.2
= control target key start
LH: loop header
LB: loop body
LE: loop exit
PB: predicated region body
PF: predicated region fallthrough
CT: control target
= control target key end

     0   :  { %vm29_vm0 = vcmask 523264   ;;  %s785_s1 = inlined_call_operand.vmem [shape: f32[128,64], index: 1, kind: input, shape index: {}]   ;;  %s786_s0 = inlined_call_operand.vmem [shape: f32[16,64], index: 0, kind: input, shape index: {}]   ;;  %s787_s2 = inlined_call_operand.vmem [shape: f32[16,128], index: 2, kind: output, shape index: {}]  }
   0x1   :  { %v28_v0 = vld [vmem:[%s785_s1 + $0x78] sm:$0xff]  ;;  %v27_v1 = vld [vmem:[%s785_s1 + $0x70] sm:$0xff]  ;;  %v26_v2 = vld [vmem:[%s785_s1 + $0x68] sm:$0xff] }
   0x2   :  { %v82_v3 = vsel %vm29_vm0, %v28_v0, 0  ;;  %v79_v4 = vsel %vm29_vm0, %v27_v1, 0  ;;  %v76_v5 = vsel %vm29_vm0, %v26_v2, 0  ;;  %v25_v6 = vld [vmem:[%s785_s1 + $0x60] sm:$0xff]  ;;  %v24_v7 = vld [vmem:[%s785_s1 + $0x58] sm:$0xff]  ;;  %v23_v17 = vld [vmem:[%s785_s1 + $0x50] sm:$0xff] }
   0x3   :  { %v527_v8 = vand.u32 4294901760, %v82_v3  ;;  %v529_v9 = vand.u32 4294901760, %v79_v4  ;;  %v531_v10 = vand.u32 4294901760, %v76_v5  ;;  %v73_v11 = vsel %vm29_vm0, %v25_v6, 0  ;;  %v22_v26 = vld [vmem:[%s785_s1 + $0x48] sm:$0xff]  ;;  %v21_v34 = vld [vmem:[%s785_s1 + $0x40] sm:$0xff] }
   0x4   :  { %v534_v12 = vand.u32 4294901760, %v73_v11  ;;  %v70_v16 = vsel %vm29_vm0, %v24_v7, 0  ;;  %v67_v21 = vsel %vm29_vm0, %v23_v17, 0  ;;  %v64_v29 = vsel %vm29_vm0, %v22_v26, 0  ;;  %v20_v41 = vld [vmem:[%s785_s1 + $0x38] sm:$0xff]  ;;  %v19_v48 = vld [vmem:[%s785_s1 + $0x30] sm:$0xff] }
   0x5   :  { %85 = vmatpush.xpose.msra.mxu0 %v527_v8  ;;  %v134_v13 = vsub.f32 %v82_v3, %v527_v8  ;;  %298 = vmatpush.xpose.msra.mxu3 %v527_v8  ;;  %v140_v14 = vsub.f32 %v79_v4, %v529_v9  ;;  %v146_v15 = vsub.f32 %v76_v5, %v531_v10  ;;  %v549_v20 = vand.u32 4294901760, %v70_v16  ;;  %v18_v54 = vld [vmem:[%s785_s1 + $0x28] sm:$0xff]  ;;  %v17_v62 = vld [vmem:[%s785_s1 + $0x20] sm:$0xff]  ;;  %v16_v5 = vld [vmem:[%s785_s1 + $0x18] sm:$0xff] }
   0x6   :  { %v152_v24 = vsub.f32 %v73_v11, %v534_v12  ;;  %v562_v28 = vand.u32 4294901760, %v67_v21  ;;  %v574_v35 = vand.u32 4294901760, %v64_v29  ;;  %v61_v36 = vsel %vm29_vm0, %v21_v34, 0 }
   0x7   :  { %240 = vmatpush.xpose.msra.mxu2 %v134_v13  ;;  %v545_v18 = vand.u32 4294901760, %v134_v13  ;;  %v547_v19 = vand.u32 4294901760, %v140_v14  ;;  %v557_v25 = vand.u32 4294901760, %v146_v15  ;;  %v158_v32 = vsub.f32 %v70_v16, %v549_v20  ;;  %v15_v16 = vld [vmem:[%s785_s1 + $0x10] sm:$0xff] }
   0x8   :  { %v568_v33 = vand.u32 4294901760, %v152_v24  ;;  %v164_v39 = vsub.f32 %v67_v21, %v562_v28  ;;  %v586_v42 = vand.u32 4294901760, %v61_v36  ;;  %v170_v45 = vsub.f32 %v64_v29, %v574_v35 }
   0x9   :  { %87 = vmatpush.xpose.msra.mxu0 %v529_v9  ;;  %v136_v22 = vsub.f32 %v134_v13, %v545_v18  ;;  %300 = vmatpush.xpose.msra.mxu3 %v529_v9  ;;  %v142_v23 = vsub.f32 %v140_v14, %v547_v19  ;;  %v148_v31 = vsub.f32 %v146_v15, %v557_v25  ;;  %v580_v40 = vand.u32 4294901760, %v158_v32 }
   0xa   :  { %v154_v38 = vsub.f32 %v152_v24, %v568_v33  ;;  %v591_v46 = vand.u32 4294901760, %v164_v39  ;;  %v58_v47 = vsel %vm29_vm0, %v20_v41, 0  ;;  %v176_v49 = vsub.f32 %v61_v36, %v586_v42 }
   0xb   :  { %243 = vmatpush.xpose.msra.mxu2 %v140_v14  ;;  %v137_v27 = vand.u32 4294901760, %v136_v22  ;;  %v143_v30 = vand.u32 4294901760, %v142_v23  ;;  %v149_v37 = vand.u32 4294901760, %v148_v31  ;;  %v160_v44 = vsub.f32 %v158_v32, %v580_v40 }
   0xc   :  { %v155_v43 = vand.u32 4294901760, %v154_v38  ;;  %v166_v51 = vsub.f32 %v164_v39, %v591_v46  ;;  %v601_v52 = vand.u32 4294901760, %v58_v47  ;;  %v603_v53 = vand.u32 4294901760, %v170_v45 }
   0xd   :  { %89 = vmatpush.xpose.msra.mxu0 %v531_v10  ;;  %138 = vmatpush.xpose.msra.mxu1 %v137_v27  ;;  %v161_v50 = vand.u32 4294901760, %v160_v44  ;;  %v55_v55 = vsel %vm29_vm0, %v19_v48, 0  ;;  %v610_v56 = vand.u32 4294901760, %v176_v49  ;;  %v52_v57 = vsel %vm29_vm0, %v18_v54, 0  ;;  %v14_v27 = vld [vmem:[%s785_s1 + $0x8] sm:$0xff] }
   0xe   :  { %302 = vmatpush.xpose.msra.mxu3 %v531_v10  ;;  %v167_v58 = vand.u32 4294901760, %v166_v51  ;;  %v172_v59 = vsub.f32 %v170_v45, %v603_v53  ;;  %v182_v60 = vsub.f32 %v58_v47, %v601_v52  ;;  %v616_v61 = vand.u32 4294901760, %v55_v55 }
   0xf   :  { %246 = vmatpush.xpose.msra.mxu2 %v146_v15  ;;  %v178_v63 = vsub.f32 %v176_v49, %v610_v56  ;;  %v623_v0 = vand.u32 4294901760, %v52_v57  ;;  %v49_v4 = vsel %vm29_vm0, %v17_v62, 0  ;;  %v46_v15 = vsel %vm29_vm0, %v16_v5, 0 }
  0x10   :  { %v173_v1 = vand.u32 4294901760, %v172_v59  ;;  %v188_v2 = vsub.f32 %v55_v55, %v616_v61  ;;  %v627_v3 = vand.u32 4294901760, %v182_v60  ;;  %v634_v6 = vand.u32 4294901760, %v49_v4 }
  0x11   :  { %91 = vmatpush.xpose.msra.mxu0 %v534_v12  ;;  %144 = vmatpush.xpose.msra.mxu1 %v143_v30  ;;  %v179_v7 = vand.u32 4294901760, %v178_v63  ;;  %v194_v13 = vsub.f32 %v52_v57, %v623_v0  ;;  %v649_v23 = vand.u32 4294901760, %v46_v15  ;;  %v43_v26 = vsel %vm29_vm0, %v15_v16, 0 }
  0x12   :  { %304 = vmatpush.xpose.msra.mxu3 %v534_v12  ;;  %v184_v11 = vsub.f32 %v182_v60, %v627_v3  ;;  %v639_v14 = vand.u32 4294901760, %v188_v2  ;;  %v200_v17 = vsub.f32 %v49_v4, %v634_v6  ;;  %v663_v34 = vand.u32 4294901760, %v43_v26  ;;  %v11_v4 = vld [vmem:[%s786_s0] sm:$0xff] }
  0x13   :  { %249 = vmatpush.xpose.msra.mxu2 %v152_v24  ;;  %v651_v24 = vand.u32 4294901760, %v194_v13  ;;  %v40_v36 = vsel %vm29_vm0, %v14_v27, 0  ;;  %v31_v5 = vsel %vm29_vm0, %v11_v4, 0 }
  0x14   :  { %v185_v21 = vand.u32 4294901760, %v184_v11  ;;  %v190_v22 = vsub.f32 %v188_v2, %v639_v14  ;;  %v658_v29 = vand.u32 4294901760, %v200_v17  ;;  %v212_v41 = vsub.f32 %v43_v26, %v663_v34 }
  0x15   :  { %93 = vmatpush.xpose.msra.mxu0 %v549_v20  ;;  %150 = vmatpush.xpose.msra.mxu1 %v149_v37  ;;  %v196_v31 = vsub.f32 %v194_v13, %v651_v24  ;;  %v13_v37 = vld [vmem:[%s785_s1] sm:$0xff] }
  0x16   :  { %306 = vmatpush.xpose.msra.mxu3 %v549_v20  ;;  %v191_v30 = vand.u32 4294901760, %v190_v22  ;;  %v202_v38 = vsub.f32 %v200_v17, %v658_v29  ;;  %v684_v51 = vand.u32 4294901760, %v212_v41 }
  0x17   :  { %252 = vmatpush.xpose.msra.mxu2 %v158_v32  ;;  %v206_v32 = vsub.f32 %v46_v15, %v649_v23 }
  0x18   :  { %v203_v47 = vand.u32 4294901760, %v202_v38  ;;  %v214_v55 = vsub.f32 %v212_v41, %v684_v51 }
  0x19   :  { %95 = vmatpush.xpose.msra.mxu0 %v562_v28  ;;  %156 = vmatpush.xpose.msra.mxu1 %v155_v43  ;;  %v673_v43 = vand.u32 4294901760, %v40_v36  ;;  %v675_v44 = vand.u32 4294901760, %v206_v32 }
  0x1a   :  { %308 = vmatpush.xpose.msra.mxu3 %v562_v28  ;;  %v215_v59 = vand.u32 4294901760, %v214_v55 }
  0x1b   :  { %255 = vmatpush.xpose.msra.mxu2 %v164_v39  ;;  %v197_v39 = vand.u32 4294901760, %v196_v31  ;;  %v208_v48 = vsub.f32 %v206_v32, %v675_v44 }
  0x1d   :  { %97 = vmatpush.xpose.msra.mxu0 %v574_v35  ;;  %162 = vmatpush.xpose.msra.mxu1 %v161_v50  ;;  %v209_v54 = vand.u32 4294901760, %v208_v48 }
  0x1e   :  { %310 = vmatpush.xpose.msra.mxu3 %v574_v35 }
  0x1f   :  { %258 = vmatpush.xpose.msra.mxu2 %v170_v45  ;;  %v37_v45 = vsel %vm29_vm0, %v13_v37, 0 }
  0x20   :  { %v682_v50 = vand.u32 4294901760, %v37_v45 }
  0x21   :  { %99 = vmatpush.xpose.msra.mxu0 %v586_v42  ;;  %168 = vmatpush.xpose.msra.mxu1 %v167_v58 }
  0x22   :  { %312 = vmatpush.xpose.msra.mxu3 %v586_v42  ;;  %v224_v57 = vsub.f32 %v37_v45, %v682_v50 }
  0x23   :  { %261 = vmatpush.xpose.msra.mxu2 %v176_v49  ;;  %v218_v49 = vsub.f32 %v40_v36, %v673_v43 }
  0x24   :  { %v695_v62 = vand.u32 4294901760, %v224_v57 }
  0x25   :  { %101 = vmatpush.xpose.msra.mxu0 %v601_v52  ;;  %174 = vmatpush.xpose.msra.mxu1 %v173_v1  ;;  %v690_v58 = vand.u32 4294901760, %v218_v49 }
  0x26   :  { %314 = vmatpush.xpose.msra.mxu3 %v601_v52  ;;  %v226_v1 = vsub.f32 %v224_v57, %v695_v62 }
  0x27   :  { %264 = vmatpush.xpose.msra.mxu2 %v182_v60  ;;  %v220_v60 = vsub.f32 %v218_v49, %v690_v58 }
  0x29   :  { %103 = vmatpush.xpose.msra.mxu0 %v616_v61  ;;  %180 = vmatpush.xpose.msra.mxu1 %v179_v7  ;;  %v221_v63 = vand.u32 4294901760, %v220_v60  ;;  %v710_v7 = vand.u32 4294901760, %v31_v5 }
  0x2a   :  { %316 = vmatpush.xpose.msra.mxu3 %v616_v61 }
  0x2b   :  { %267 = vmatpush.xpose.msra.mxu2 %v188_v2  ;;  %v227_v2 = vand.u32 4294901760, %v226_v1  ;;  %v117_v11 = vsub.f32 %v31_v5, %v710_v7 }
  0x2d   :  { %105 = vmatpush.xpose.msra.mxu0 %v623_v0  ;;  %186 = vmatpush.xpose.msra.mxu1 %v185_v21 }
  0x2e   :  { %318 = vmatpush.xpose.msra.mxu3 %v623_v0 }
  0x2f   :  { %270 = vmatpush.xpose.msra.mxu2 %v194_v13 }
  0x31   :  { %107 = vmatpush.xpose.msra.mxu0 %v634_v6  ;;  %192 = vmatpush.xpose.msra.mxu1 %v191_v30 }
  0x32   :  { %320 = vmatpush.xpose.msra.mxu3 %v634_v6 }
  0x33   :  { %273 = vmatpush.xpose.msra.mxu2 %v200_v17 }
  0x35   :  { %109 = vmatpush.xpose.msra.mxu0 %v649_v23  ;;  %198 = vmatpush.xpose.msra.mxu1 %v197_v39 }
  0x36   :  { %322 = vmatpush.xpose.msra.mxu3 %v649_v23 }
  0x37   :  { %276 = vmatpush.xpose.msra.mxu2 %v206_v32 }
  0x39   :  { %111 = vmatpush.xpose.msra.mxu0 %v663_v34  ;;  %204 = vmatpush.xpose.msra.mxu1 %v203_v47 }
  0x3a   :  { %324 = vmatpush.xpose.msra.mxu3 %v663_v34 }
  0x3b   :  { %279 = vmatpush.xpose.msra.mxu2 %v212_v41 }
  0x3d   :  { %113 = vmatpush.xpose.msra.mxu0 %v673_v43  ;;  %210 = vmatpush.xpose.msra.mxu1 %v209_v54 }
  0x3e   :  { %326 = vmatpush.xpose.msra.mxu3 %v673_v43 }
  0x3f   :  { %282 = vmatpush.xpose.msra.mxu2 %v218_v49 }
  0x41   :  { %115 = vmatpush.xpose.msra.mxu0 %v682_v50  ;;  %216 = vmatpush.xpose.msra.mxu1 %v215_v59 }
  0x42   :  { %328 = vmatpush.xpose.msra.mxu3 %v682_v50 }
  0x43   :  { %285 = vmatpush.xpose.msra.mxu2 %v224_v57 }
  0x45   :  { %345 = vmatpush.xpose.msrb.mxu0 %v545_v18  ;;  %222 = vmatpush.xpose.msra.mxu1 %v221_v63 }
  0x46   :  { %478 = vmatpush.xpose.msrb.mxu3 %v527_v8  ;;  %288 = vmatmul.f32.vlgmr.msra.gmra.mxu2 %v117_v11 }
  0x47   :  { %462 = vmatpush.xpose.msrb.mxu2 %v545_v18  ;;  %v118_v18 = vand.u32 4294901760, %v117_v11 }
  0x49   :  { %349 = vmatpush.xpose.msrb.mxu0 %v547_v19  ;;  %228 = vmatpush.xpose.msra.mxu1 %v227_v2  ;;  %v119_v13 = vsub.f32 %v117_v11, %v118_v18 }
  0x4a   :  { %479 = vmatpush.xpose.msrb.mxu3 %v529_v9 }
  0x4b   :  { %463 = vmatpush.xpose.msrb.mxu2 %v547_v19  ;;  %332 = vmatmul.f32.vlgmr.msra.gmra.mxu3 %v118_v18  ;;  %v12_v19 = vld [vmem:[%s786_s0 + $0x8] sm:$0xff]  ;;  %v120_v15 = vand.u32 4294901760, %v119_v13 }
  0x4c   :  { %230 = vmatmul.f32.vlgmr.msra.gmra.mxu1 %v710_v7 }
  0x4d   :  { %353 = vmatpush.xpose.msrb.mxu0 %v557_v25  ;;  %416 = vmatpush.xpose.msrb.mxu1 %v527_v8  ;;  %v34_v8 = vsel %vm29_vm0, %v12_v19, 0 }
  0x4e   :  { %480 = vmatpush.xpose.msrb.mxu3 %v531_v10  ;;  %v124_v16 = vand.u32 4294901760, %v34_v8  ;;  %121 = vmatmul.f32.vlgmr.msra.gmra.mxu0 %v120_v15 }
  0x4f   :  { %464 = vmatpush.xpose.msrb.mxu2 %v557_v25 }
  0x50   :  { %v125_v25 = vsub.f32 %v34_v8, %v124_v16 }
  0x51   :  { %357 = vmatpush.xpose.msrb.mxu0 %v568_v33  ;;  %418 = vmatpush.xpose.msrb.mxu1 %v529_v9 }
  0x52   :  { %481 = vmatpush.xpose.msrb.mxu3 %v534_v12  ;;  %v126_v17 = vand.u32 4294901760, %v125_v25  ;;  %293 = vmatmul.f32.gmra.mxu2 %v125_v25 }
  0x53   :  { %465 = vmatpush.xpose.msrb.mxu2 %v568_v33 }
  0x54   :  { %234 = vmatmul.f32.gmra.mxu1 %v124_v16  ;;  %v127_v9 = vsub.f32 %v125_v25, %v126_v17  ;;  %338 = vmatmul.f32.gmra.mxu3 %v126_v17 }
  0x55   :  { %361 = vmatpush.xpose.msrb.mxu0 %v580_v40  ;;  %420 = vmatpush.xpose.msrb.mxu1 %v531_v10 }
  0x56   :  { %482 = vmatpush.xpose.msrb.mxu3 %v549_v20  ;;  %v128_v33 = vand.u32 4294901760, %v127_v9 }
  0x57   :  { %466 = vmatpush.xpose.msrb.mxu2 %v580_v40 }
  0x58   :  { %129 = vmatmul.f32.gmra.mxu0 %v128_v33 }
  0x59   :  { %365 = vmatpush.xpose.msrb.mxu0 %v591_v46  ;;  %422 = vmatpush.xpose.msrb.mxu1 %v534_v12 }
  0x5a   :  { %483 = vmatpush.xpose.msrb.mxu3 %v562_v28 }
  0x5b   :  { %467 = vmatpush.xpose.msrb.mxu2 %v591_v46 }
  0x5d   :  { %369 = vmatpush.xpose.msrb.mxu0 %v603_v53  ;;  %424 = vmatpush.xpose.msrb.mxu1 %v549_v20 }
  0x5e   :  { %484 = vmatpush.xpose.msrb.mxu3 %v574_v35 }
  0x5f   :  { %468 = vmatpush.xpose.msrb.mxu2 %v603_v53 }
  0x61   :  { %373 = vmatpush.xpose.msrb.mxu0 %v610_v56  ;;  %426 = vmatpush.xpose.msrb.mxu1 %v562_v28 }
  0x62   :  { %485 = vmatpush.xpose.msrb.mxu3 %v586_v42 }
  0x63   :  { %469 = vmatpush.xpose.msrb.mxu2 %v610_v56 }
  0x65   :  { %377 = vmatpush.xpose.msrb.mxu0 %v627_v3  ;;  %428 = vmatpush.xpose.msrb.mxu1 %v574_v35 }
  0x66   :  { %486 = vmatpush.xpose.msrb.mxu3 %v601_v52 }
  0x67   :  { %470 = vmatpush.xpose.msrb.mxu2 %v627_v3 }
  0x69   :  { %381 = vmatpush.xpose.msrb.mxu0 %v639_v14  ;;  %430 = vmatpush.xpose.msrb.mxu1 %v586_v42 }
  0x6a   :  { %487 = vmatpush.xpose.msrb.mxu3 %v616_v61 }
  0x6b   :  { %471 = vmatpush.xpose.msrb.mxu2 %v639_v14 }
  0x6d   :  { %385 = vmatpush.xpose.msrb.mxu0 %v651_v24  ;;  %432 = vmatpush.xpose.msrb.mxu1 %v601_v52 }
  0x6e   :  { %488 = vmatpush.xpose.msrb.mxu3 %v623_v0 }
  0x6f   :  { %472 = vmatpush.xpose.msrb.mxu2 %v651_v24 }
  0x71   :  { %389 = vmatpush.xpose.msrb.mxu0 %v658_v29  ;;  %434 = vmatpush.xpose.msrb.mxu1 %v616_v61 }
  0x72   :  { %489 = vmatpush.xpose.msrb.mxu3 %v634_v6 }
  0x73   :  { %473 = vmatpush.xpose.msrb.mxu2 %v658_v29 }
  0x75   :  { %393 = vmatpush.xpose.msrb.mxu0 %v675_v44  ;;  %436 = vmatpush.xpose.msrb.mxu1 %v623_v0 }
  0x76   :  { %490 = vmatpush.xpose.msrb.mxu3 %v649_v23 }
  0x77   :  { %474 = vmatpush.xpose.msrb.mxu2 %v675_v44 }
  0x79   :  { %397 = vmatpush.xpose.msrb.mxu0 %v684_v51  ;;  %438 = vmatpush.xpose.msrb.mxu1 %v634_v6 }
  0x7a   :  { %491 = vmatpush.xpose.msrb.mxu3 %v663_v34 }
  0x7b   :  { %475 = vmatpush.xpose.msrb.mxu2 %v684_v51 }
  0x7d   :  { %401 = vmatpush.xpose.msrb.mxu0 %v690_v58  ;;  %440 = vmatpush.xpose.msrb.mxu1 %v649_v23 }
  0x7e   :  { %492 = vmatpush.xpose.msrb.mxu3 %v673_v43 }
  0x7f   :  { %476 = vmatpush.xpose.msrb.mxu2 %v690_v58 }
  0x81   :  { %405 = vmatpush.xpose.msrb.mxu0 %v695_v62  ;;  %442 = vmatpush.xpose.msrb.mxu1 %v663_v34 }
  0x82   :  { %493 = vmatpush.xpose.msrb.mxu3 %v682_v50 }
  0x83   :  { %477 = vmatpush.xpose.msrb.mxu2 %v695_v62 }
  0x84   :  { %407 = vmatmul.f32.vlgmr.msrb.gmra.mxu0 %v710_v7 }
  0x85   :  { %444 = vmatpush.xpose.msrb.mxu1 %v673_v43  ;;  %452 = vmatmul.f32.vlgmr.msrb.gmra.mxu3 %v124_v16 }
  0x86   :  { %411 = vmatmul.f32.vlgmr.msrb.gmra.mxu2 %v124_v16 }
  0x89   :  { %446 = vmatpush.xpose.msrb.mxu1 %v682_v50 }
  0x8c   :  { %448 = vmatmul.f32.vlgmr.msrb.gmra.mxu1 %v710_v7 }
  0xc9   :  { %v231_v12 = vpop.f32.mrf.mxu1  ;;  %v289_v28 = vpop.f32.mrf.mxu2 }
  0xcb   :  { %v122_v10 = vpop.f32.mrf.mxu0 }
  0xcc   :  { %v232_v42 = vadd.f32 %v231_v12, %v122_v10 }
  0xce   :  { %v333_v20 = vpop.f32.mrf.mxu3  ;;  %v290_v56 = vadd.f32 %v289_v28, %v232_v42 }
  0xd0   :  { %v334_v3 = vadd.f32 %v333_v20, %v290_v56 }
  0xd1   :  { %v235_v40 = vpop.f32.mrf.mxu1 }
  0xd5   :  { %v130_v35 = vpop.f32.mrf.mxu0  ;;  %v294_v52 = vpop.f32.mrf.mxu2 }
  0xd6   :  { %v236_v53 = vadd.f32 %v235_v40, %v130_v35 }
  0xd7   :  { %v339_v46 = vpop.f32.mrf.mxu3 }
  0xd8   :  { %v295_v61 = vadd.f32 %v294_v52, %v236_v53 }
  0xda   :  { %v340_v14 = vadd.f32 %v339_v46, %v295_v61 }
 0x101   :  { %v408_v0 = vpop.f32.mrf.mxu0 }
 0x102   :  { %v409_v6 = vadd.f32 %v408_v0, %v334_v3 }
 0x108   :  { %v453_v21 = vpop.f32.mrf.mxu3 }
 0x109   :  { %v412_v22 = vpop.f32.mrf.mxu2  ;;  %v449_v23 = vpop.f32.mrf.mxu1 }
 0x10a   :  { %v413_v24 = vadd.f32 %v412_v22, %v340_v14  ;;  %v450_v26 = vadd.f32 %v449_v23, %v409_v6 }
 0x10c   :  { %456 = vst [vmem:[%s787_s2] sm:$0xff] %v450_v26  ;;  %v454_v27 = vadd.f32 %v453_v21, %v413_v24 }
 0x10e   :  { %457 = vst [vmem:[%s787_s2 + $0x8] sm:$0xff] %v454_v27 }

// kernel: qwen3_moe_fused_block.3
= control target key start
LH: loop header
LB: loop body
LE: loop exit
PB: predicated region body
PF: predicated region fallthrough
CT: control target
= control target key end

     0   :  { %s2039_s30 = smov [#allocation3]   ;;  %s2040_s8 = smov [#allocation4]   ;;  %s3030_s0 = inlined_call_operand.vmem [shape: s32[9], index: 0, kind: input, shape index: {}]   ;;  %s3031_s2 = inlined_call_operand.vmem [shape: f32[288,64], index: 2, kind: input, shape index: {}]   ;;  %s3032_s3 = inlined_call_operand.vmem [shape: f32[288,1], index: 3, kind: input, shape index: {}]   ;;  %s3033_s4 = inlined_call_operand.vmem [shape: f32[8,128,64], index: 4, kind: input, shape index: {}]   ;;  %s3034_s5 = inlined_call_operand.vmem [shape: f32[8,128,64], index: 5, kind: input, shape index: {}]   ;;  %s3035_s6 = inlined_call_operand.vmem [shape: f32[8,64,128], index: 6, kind: input, shape index: {}]   ;;  %s3036_s7 = inlined_call_operand.vmem [shape: f32[288,64], index: 7, kind: output, shape index: {}]   ;;  %s3037_s1 = inlined_call_operand.vmem [shape: s32[9], index: 1, kind: input, shape index: {}]  }
   0x1   :  { %s13_s26 = sshll.u32 %s3030_s0, 4  ;;  %s18_s29 = sshll.u32 %s3037_s1, 4  ;;  %s14_s26 = int_to_ptr.vmem [resolvable:$true] %s13_s26  ;;  %s19_s29 = int_to_ptr.vmem [resolvable:$true] %s18_s29 }
   0x2   :  { %16 = dma.vmem_to_smem %s14_s26, 16, %s2039_s30, [#allocation2] }
   0x3   :  { %21 = dma.vmem_to_smem %s19_s29, 16, %s2040_s8, [#allocation2] }
   0x4   :  { %2033 = dma.done.wait [#allocation2], 32 }
   0x5   :  { %2034 = vsyncadd [#allocation2], 4294967264 }
   0x6   :  { %24 = sfence }
   0x7   :  { %s2089_s9 = smov 0  }
   0x8 LB: > { %s1931_s0 = sadd.s32 4294967295, %s2037_s9   ;;  %p1935_p0 = scmp.ge.s32.totalorder %s2037_s9, 1  ;;  %s2037_s9 = sphi %s2089_s9, %s30_s9  }
   0x9   : > { %p256_p1 = scmp.lt.s32.totalorder %s2037_s9, 10 }
   0xb   : > { %p257_p2 = pnand %p1935_p0, %p256_p1 }
   0xc   : > { %s1936_s1 = sshll.u32 (!%p257_p2), %s1931_s0, 2  ;;  %s319_s10 = sld [smem:[#allocation3 + %s1931_s0]] (!%p257_p2) }
   0xd   : > { %260 = sbr.rel (%p257_p2) target bundleno = 566 (0x236), region = 40  ;;  %p308_p3 = scmp.lt.s32.totalorder (!%p257_p2), %s1936_s1, 35 }
   0xe   : > { %s326_s11 = sld [smem:[#allocation3 + %s1931_s0]] (!%p257_p2) }
   0xf   : > { %s333_s12 = sld [smem:[#allocation3 + %s1931_s0]] (!%p257_p2) }
  0x10   : > { %s2097_s13 = sld [smem:[#allocation4 + %s1931_s0]] (!%p257_p2) }
  0x12   : > { %s3117_s1 = smov (!%p308_p3, %s1936_s1), 35  ;;  %p320_p4 = scmp.lt.s32.totalorder %s319_s10, 7 }
  0x13   : > { %s1937_s14 = sshll.u32 %s3117_s1, 3 }
  0x14   : > { %s2102_s17 = scalar_lea.vmem %s3031_s2, %s1937_s14  ;;  %s2107_s20 = scalar_lea.vmem %s3032_s3, %s1937_s14 }
  0x15   : > { %p327_p5 = scmp.lt.s32.totalorder %s326_s11, 7  ;;  %p334_p6 = scmp.lt.s32.totalorder %s333_s12, 7 }
  0x16   : > { %s2112_s23 = scalar_lea.vmem %s3036_s7, %s1937_s14  ;;  %s3119_s10 = smov (!%p320_p4, %s319_s10), 7 }
  0x17   : > { %s3121_s11 = smov (!%p327_p5, %s326_s11), 7  ;;  %s1956_s24 = sshll.u32 %s3119_s10, 7 }
  0x18   : > { %s2117_s27 = scalar_lea.vmem %s3033_s4, %s1956_s24  ;;  %s1957_s28 = sshll.u32 %s3121_s11, 7 }
  0x19   : > { %s2122_s8 = scalar_lea.vmem %s3034_s5, %s1957_s28  ;;  %s3123_s12 = smov (!%p334_p6, %s333_s12), 7 }
  0x1a   : > { %s1958_s0 = sshll.u32 %s3123_s12, 6  ;;  %p1948_p7 = scmp.le.s32.totalorder %s2097_s13, 0 }
  0x1b   : > { %s2127_s14 = scalar_lea.vmem %s3035_s6, %s1958_s0 }
  0x1c   : > { %350 = sbr.rel (%p1948_p7) target bundleno = 554 (0x22a), region = 44 }
  0x21   : > { %v370_v0 = vld [vmem:[%s2117_s27 + $0x78] sm:$0xff]  ;;  %vm371_vm0 = vcmask 523264   ;;  %v369_v1 = vld [vmem:[%s2117_s27 + $0x70] sm:$0xff]  ;;  %v368_v2 = vld [vmem:[%s2117_s27 + $0x68] sm:$0xff] }
  0x22   : > { %v430_v3 = vsel %vm371_vm0, %v370_v0, 0  ;;  %v427_v4 = vsel %vm371_vm0, %v369_v1, 0  ;;  %v424_v5 = vsel %vm371_vm0, %v368_v2, 0  ;;  %v367_v6 = vld [vmem:[%s2117_s27 + $0x60] sm:$0xff]  ;;  %v366_v7 = vld [vmem:[%s2117_s27 + $0x58] sm:$0xff]  ;;  %v365_v17 = vld [vmem:[%s2117_s27 + $0x50] sm:$0xff] }
  0x23   : > { %v2138_v8 = vand.u32 4294901760, %v430_v3  ;;  %v2140_v9 = vand.u32 4294901760, %v427_v4  ;;  %v2142_v10 = vand.u32 4294901760, %v424_v5  ;;  %v421_v11 = vsel %vm371_vm0, %v367_v6, 0  ;;  %v364_v26 = vld [vmem:[%s2117_s27 + $0x48] sm:$0xff]  ;;  %v363_v34 = vld [vmem:[%s2117_s27 + $0x40] sm:$0xff] }
  0x24   : > { %v2145_v12 = vand.u32 4294901760, %v421_v11  ;;  %v418_v16 = vsel %vm371_vm0, %v366_v7, 0  ;;  %v415_v21 = vsel %vm371_vm0, %v365_v17, 0  ;;  %v412_v29 = vsel %vm371_vm0, %v364_v26, 0  ;;  %v362_v41 = vld [vmem:[%s2117_s27 + $0x38] sm:$0xff]  ;;  %v361_v48 = vld [vmem:[%s2117_s27 + $0x30] sm:$0xff] }
  0x25   : > { %433 = vmatpush.xpose.msra.mxu0 %v2138_v8  ;;  %v2149_v13 = vsub.f32 %v430_v3, %v2138_v8  ;;  %680 = vmatpush.xpose.msra.mxu3 %v2138_v8  ;;  %v2153_v14 = vsub.f32 %v427_v4, %v2140_v9  ;;  %v2156_v15 = vsub.f32 %v424_v5, %v2142_v10  ;;  %v2163_v20 = vand.u32 4294901760, %v418_v16  ;;  %v360_v54 = vld [vmem:[%s2117_s27 + $0x28] sm:$0xff]  ;;  %v359_v62 = vld [vmem:[%s2117_s27 + $0x20] sm:$0xff]  ;;  %v358_v5 = vld [vmem:[%s2117_s27 + $0x18] sm:$0xff] }
  0x26   : > { %v2176_v25 = vsub.f32 %v421_v11, %v2145_v12  ;;  %v2180_v28 = vand.u32 4294901760, %v415_v21  ;;  %v2194_v35 = vand.u32 4294901760, %v412_v29  ;;  %v409_v40 = vsel %vm371_vm0, %v363_v34, 0 }
  0x27   : > { %612 = vmatpush.xpose.msra.mxu2 %v2149_v13  ;;  %v499_v18 = vand.u32 4294901760, %v2149_v13  ;;  %v505_v19 = vand.u32 4294901760, %v2153_v14  ;;  %v511_v24 = vand.u32 4294901760, %v2156_v15  ;;  %v2189_v33 = vsub.f32 %v418_v16, %v2163_v20 }
  0x28   : > { %v3053_v32 = vand.u32 4294901760, %v2176_v25  ;;  %v2202_v39 = vsub.f32 %v415_v21, %v2180_v28  ;;  %v2209_v42 = vsub.f32 %v412_v29, %v2194_v35  ;;  %v2215_v45 = vand.u32 4294901760, %v409_v40 }
  0x29   : > { %435 = vmatpush.xpose.msra.mxu0 %v2140_v9  ;;  %v500_v22 = vsub.f32 %v2149_v13, %v499_v18  ;;  %682 = vmatpush.xpose.msra.mxu3 %v2140_v9  ;;  %v506_v23 = vsub.f32 %v2153_v14, %v505_v19  ;;  %v512_v31 = vsub.f32 %v2156_v15, %v511_v24  ;;  %v3052_v38 = vand.u32 4294901760, %v2189_v33 }
  0x2a   : > { %v518_v37 = vsub.f32 %v2176_v25, %v3053_v32  ;;  %v3051_v46 = vand.u32 4294901760, %v2202_v39  ;;  %v406_v47 = vsel %vm371_vm0, %v362_v41, 0  ;;  %v3049_v49 = vand.u32 4294901760, %v2209_v42  ;;  %v880_v41 = vld [vmem:[%s2122_s8 + $0x70] sm:$0xff] }
  0x2b   : > { %v501_v27 = vand.u32 4294901760, %v500_v22  ;;  %615 = vmatpush.xpose.msra.mxu2 %v2153_v14  ;;  %v507_v30 = vand.u32 4294901760, %v506_v23  ;;  %v513_v36 = vand.u32 4294901760, %v512_v31  ;;  %v524_v44 = vsub.f32 %v2189_v33, %v3052_v38  ;;  %v357_v22 = vld [vmem:[%s2117_s27 + $0x10] sm:$0xff]  ;;  %v881_v31 = vld [vmem:[%s2122_s8 + $0x78] sm:$0xff] }
  0x2c   : > { %v519_v43 = vand.u32 4294901760, %v518_v37  ;;  %v530_v51 = vsub.f32 %v2202_v39, %v3051_v46  ;;  %v2227_v52 = vand.u32 4294901760, %v406_v47  ;;  %v2230_v53 = vsub.f32 %v409_v40, %v2215_v45 }
  0x2d   : > { %437 = vmatpush.xpose.msra.mxu0 %v2142_v10  ;;  %502 = vmatpush.xpose.msra.mxu1 %v501_v27  ;;  %v525_v50 = vand.u32 4294901760, %v524_v44  ;;  %v403_v55 = vsel %vm371_vm0, %v361_v48, 0  ;;  %v536_v56 = vsub.f32 %v2209_v42, %v3049_v49  ;;  %v400_v57 = vsel %vm371_vm0, %v360_v54, 0  ;;  %v874_v49 = vld [vmem:[%s2122_s8 + $0x40] sm:$0xff] }
  0x2e   : > { %684 = vmatpush.xpose.msra.mxu3 %v2142_v10  ;;  %v531_v58 = vand.u32 4294901760, %v530_v51  ;;  %v2241_v59 = vand.u32 4294901760, %v403_v55  ;;  %v3046_v60 = vand.u32 4294901760, %v2230_v53  ;;  %v2245_v61 = vsub.f32 %v406_v47, %v2227_v52  ;;  %v355_v51 = vld [vmem:[%s2117_s27] sm:$0xff] }
  0x2f   : > { %618 = vmatpush.xpose.msra.mxu2 %v2156_v15  ;;  %v537_v63 = vand.u32 4294901760, %v536_v56  ;;  %v2250_v0 = vand.u32 4294901760, %v400_v57  ;;  %v397_v4 = vsel %vm371_vm0, %v359_v62, 0  ;;  %v394_v21 = vsel %vm371_vm0, %v358_v5, 0 }
  0x30   : > { %v542_v1 = vsub.f32 %v2230_v53, %v3046_v60  ;;  %v3045_v2 = vand.u32 4294901760, %v2245_v61  ;;  %v2258_v3 = vsub.f32 %v403_v55, %v2241_v59  ;;  %v2264_v6 = vand.u32 4294901760, %v397_v4  ;;  %v875_v60 = vld [vmem:[%s2122_s8 + $0x48] sm:$0xff] }
  0x31   : > { %439 = vmatpush.xpose.msra.mxu0 %v2145_v12  ;;  %508 = vmatpush.xpose.msra.mxu1 %v507_v30  ;;  %v2272_v17 = vsub.f32 %v400_v57, %v2250_v0  ;;  %v2285_v29 = vand.u32 4294901760, %v394_v21  ;;  %v391_v34 = vsel %vm371_vm0, %v357_v22, 0  ;;  %v928_v40 = vsel %vm371_vm0, %v881_v31, 0  ;;  %v879_v57 = vld [vmem:[%s2122_s8 + $0x68] sm:$0xff]  ;;  %v878_v22 = vld [vmem:[%s2122_s8 + $0x60] sm:$0xff] }
  0x32   : > { %686 = vmatpush.xpose.msra.mxu3 %v2145_v12  ;;  %v543_v7 = vand.u32 4294901760, %v542_v1  ;;  %v548_v11 = vsub.f32 %v2245_v61, %v3045_v2  ;;  %v3042_v16 = vand.u32 4294901760, %v2258_v3  ;;  %v2279_v23 = vsub.f32 %v397_v4, %v2264_v6 }
  0x33   : > { %621 = vmatpush.xpose.msra.mxu2 %v2176_v25  ;;  %v3041_v30 = vand.u32 4294901760, %v2272_v17  ;;  %v2300_v47 = vand.u32 4294901760, %v391_v34  ;;  %v2303_v48 = vsub.f32 %v394_v21, %v2285_v29  ;;  %v2309_v54 = vand.u32 4294901760, %v928_v40 }
  0x34   : > { %v549_v26 = vand.u32 4294901760, %v548_v11  ;;  %v554_v27 = vsub.f32 %v2258_v3, %v3042_v16  ;;  %v3040_v37 = vand.u32 4294901760, %v2279_v23  ;;  %v925_v55 = vsel %vm371_vm0, %v880_v41, 0 }
  0x35   : > { %441 = vmatpush.xpose.msra.mxu0 %v2163_v20  ;;  %514 = vmatpush.xpose.msra.mxu1 %v513_v36  ;;  %v356_v36 = vld [vmem:[%s2117_s27 + $0x8] sm:$0xff]  ;;  %v560_v44 = vsub.f32 %v2272_v17, %v3041_v30  ;;  %v2321_v1 = vsub.f32 %v391_v34, %v2300_v47  ;;  %v385_v4 = vsel %vm371_vm0, %v355_v51, 0  ;;  %v2325_v5 = vand.u32 4294901760, %v925_v55  ;;  %v876_v30 = vld [vmem:[%s2122_s8 + $0x50] sm:$0xff] }
  0x36   : > { %688 = vmatpush.xpose.msra.mxu3 %v2163_v20  ;;  %v566_v56 = vsub.f32 %v2279_v23, %v3040_v37  ;;  %v922_v11 = vsel %vm371_vm0, %v879_v57, 0  ;;  %v913_v2 = vsel %vm371_vm0, %v876_v30, 0  ;;  %v910_v13 = vsel %vm371_vm0, %v875_v60, 0 }
  0x37   : > { %624 = vmatpush.xpose.msra.mxu2 %v2189_v33  ;;  %v3038_v31 = vand.u32 4294901760, %v2321_v1  ;;  %v2436_v32 = vand.u32 4294901760, %v910_v13 }
  0x38   : > { %v567_v21 = vand.u32 4294901760, %v566_v56  ;;  %v877_v56 = vld [vmem:[%s2122_s8 + $0x58] sm:$0xff] }
  0x39   : > { %443 = vmatpush.xpose.msra.mxu0 %v2180_v28  ;;  %520 = vmatpush.xpose.msra.mxu1 %v519_v43  ;;  %v555_v43 = vand.u32 4294901760, %v554_v27  ;;  %v2337_v27 = vand.u32 4294901760, %v385_v4 }
  0x3a   : > { %690 = vmatpush.xpose.msra.mxu3 %v2180_v28 }
  0x3b   : > { %627 = vmatpush.xpose.msra.mxu2 %v2202_v39 }
  0x3d   : > { %445 = vmatpush.xpose.msra.mxu0 %v2194_v35  ;;  %526 = vmatpush.xpose.msra.mxu1 %v525_v50  ;;  %v388_v50 = vsel %vm371_vm0, %v356_v36, 0  ;;  %v2345_v36 = vsub.f32 %v925_v55, %v2325_v5  ;;  %v2358_v55 = vsub.f32 %v385_v4, %v2337_v27  ;;  %v916_v4 = vsel %vm371_vm0, %v877_v56, 0 }
  0x3e   : > { %692 = vmatpush.xpose.msra.mxu3 %v2194_v35  ;;  %v2317_v62 = vand.u32 4294901760, %v388_v50 }
  0x3f   : > { %630 = vmatpush.xpose.msra.mxu2 %v2209_v42  ;;  %v3047_v57 = vand.u32 4294901760, %v2345_v36  ;;  %v3048_v37 = vand.u32 4294901760, %v2358_v55 }
  0x40   : > { %v2341_v34 = vsub.f32 %v388_v50, %v2317_v62  ;;  %v578_v50 = vsub.f32 %v2321_v1, %v3038_v31 }
  0x41   : > { %447 = vmatpush.xpose.msra.mxu0 %v2215_v45  ;;  %532 = vmatpush.xpose.msra.mxu1 %v531_v58  ;;  %v561_v58 = vand.u32 4294901760, %v560_v44  ;;  %v1004_v56 = vsub.f32 %v2345_v36, %v3047_v57 }
  0x42   : > { %694 = vmatpush.xpose.msra.mxu3 %v2215_v45  ;;  %v3044_v51 = vand.u32 4294901760, %v2341_v34 }
  0x43   : > { %633 = vmatpush.xpose.msra.mxu2 %v2230_v53  ;;  %v1005_v30 = vand.u32 4294901760, %v1004_v56  ;;  %v352_v56 = vld [vmem:[%s2102_s17 + $0x8] sm:$0xff] }
  0x45   : > { %449 = vmatpush.xpose.msra.mxu0 %v2227_v52  ;;  %538 = vmatpush.xpose.msra.mxu1 %v537_v63  ;;  %v3039_v63 = vand.u32 4294901760, %v2303_v48 }
  0x46   : > { %696 = vmatpush.xpose.msra.mxu3 %v2227_v52 }
  0x47   : > { %636 = vmatpush.xpose.msra.mxu2 %v2245_v61 }
  0x49   : > { %451 = vmatpush.xpose.msra.mxu0 %v2241_v59  ;;  %544 = vmatpush.xpose.msra.mxu1 %v543_v7  ;;  %v2329_v7 = vsub.f32 %v928_v40, %v2309_v54  ;;  %v2347_v40 = vand.u32 4294901760, %v922_v11 }
  0x4a   : > { %698 = vmatpush.xpose.msra.mxu3 %v2241_v59 }
  0x4b   : > { %639 = vmatpush.xpose.msra.mxu2 %v2258_v3  ;;  %v3043_v41 = vand.u32 4294901760, %v2329_v7 }
  0x4d   : > { %453 = vmatpush.xpose.msra.mxu0 %v2250_v0  ;;  %550 = vmatpush.xpose.msra.mxu1 %v549_v26  ;;  %v572_v26 = vsub.f32 %v2303_v48, %v3039_v63  ;;  %v579_v63 = vand.u32 4294901760, %v578_v50 }
  0x4e   : > { %700 = vmatpush.xpose.msra.mxu3 %v2250_v0 }
  0x4f   : > { %642 = vmatpush.xpose.msra.mxu2 %v2272_v17  ;;  %v573_v44 = vand.u32 4294901760, %v572_v26  ;;  %v351_v26 = vld [vmem:[%s2102_s17] sm:$0xff] }
  0x50   : > { %v373_v31 = vsel %vm371_vm0, %v351_v26, 0 }
  0x51   : > { %455 = vmatpush.xpose.msra.mxu0 %v2264_v6  ;;  %556 = vmatpush.xpose.msra.mxu1 %v555_v43  ;;  %v919_v43 = vsel %vm371_vm0, %v878_v22, 0  ;;  %v998_v22 = vsub.f32 %v2329_v7, %v3043_v41  ;;  %v2381_v16 = vand.u32 4294901760, %v373_v31  ;;  %v2392_v41 = vand.u32 4294901760, %v916_v4 }
  0x52   : > { %702 = vmatpush.xpose.msra.mxu3 %v2264_v6 }
  0x53   : > { %645 = vmatpush.xpose.msra.mxu2 %v2279_v23  ;;  %v999_v50 = vand.u32 4294901760, %v998_v22 }
  0x55   : > { %457 = vmatpush.xpose.msra.mxu0 %v2285_v29  ;;  %562 = vmatpush.xpose.msra.mxu1 %v561_v58  ;;  %v2364_v58 = vsub.f32 %v922_v11, %v2347_v40  ;;  %v584_v11 = vsub.f32 %v2341_v34, %v3044_v51  ;;  %v2395_v51 = vsub.f32 %v373_v31, %v2381_v16 }
  0x56   : > { %704 = vmatpush.xpose.msra.mxu3 %v2285_v29 }
  0x57   : > { %648 = vmatpush.xpose.msra.mxu2 %v2303_v48  ;;  %v3050_v26 = vand.u32 4294901760, %v2364_v58  ;;  %3069 = vst [vmem:[#allocation6_spill] sm:$0xff] %v2395_v51  ;;  %v585_v57 = vand.u32 4294901760, %v584_v11  ;;  %v2404_v22 = vand.u32 4294901760, %v2395_v51  ;;  %v2415_v11 = vsub.f32 %v916_v4, %v2392_v41 }
  0x59   : > { %459 = vmatpush.xpose.msra.mxu0 %v2300_v47  ;;  %568 = vmatpush.xpose.msra.mxu1 %v567_v21  ;;  %v2366_v21 = vand.u32 4294901760, %v919_v43  ;;  %3070 = vst [vmem:[#allocation7_spill] sm:$0xff] %v2404_v22  ;;  %v1010_v31 = vsub.f32 %v2364_v58, %v3050_v26  ;;  %v376_v26 = vsel %vm371_vm0, %v352_v56, 0 }
  0x5a   : > { %706 = vmatpush.xpose.msra.mxu3 %v2300_v47  ;;  %v2428_v4 = vand.u32 4294901760, %v376_v26 }
  0x5b   : > { %651 = vmatpush.xpose.msra.mxu2 %v2321_v1  ;;  %v1011_v60 = vand.u32 4294901760, %v1010_v31 }
  0x5c   : > { %v2446_v14 = vsub.f32 %v376_v26, %v2428_v4 }
  0x5d   : > { %461 = vmatpush.xpose.msra.mxu0 %v2317_v62  ;;  %574 = vmatpush.xpose.msra.mxu1 %v573_v44  ;;  %v2389_v44 = vsub.f32 %v919_v43, %v2366_v21  ;;  %v590_v43 = vsub.f32 %v2358_v55, %v3048_v37  ;;  %v2417_v37 = vand.u32 4294901760, %v913_v2 }
  0x5e   : > { %708 = vmatpush.xpose.msra.mxu3 %v2317_v62  ;;  %3071 = vst [vmem:[#allocation8_spill] sm:$0xff] %v2446_v14 }
  0x5f   : > { %654 = vmatpush.xpose.msra.mxu2 %v2341_v34  ;;  %v591_v46 = vand.u32 4294901760, %v590_v43  ;;  %v2441_v43 = vsub.f32 %v913_v2, %v2417_v37  ;;  %v2457_v2 = vsub.f32 %v910_v13, %v2436_v32 }
  0x61   : > { %463 = vmatpush.xpose.msra.mxu0 %v2337_v27  ;;  %580 = vmatpush.xpose.msra.mxu1 %v579_v63  ;;  %v3055_v63 = vand.u32 4294901760, %v2389_v44  ;;  %3073 = vst [vmem:[#allocation10_spill] sm:$0xff] %v2457_v2 }
  0x62   : > { %710 = vmatpush.xpose.msra.mxu3 %v2337_v27 }
  0x63   : > { %657 = vmatpush.xpose.msra.mxu2 %v2358_v55  ;;  %v1016_v38 = vsub.f32 %v2389_v44, %v3055_v63 }
  0x65   : > { %739 = vmatpush.xpose.msrb.mxu0 %v499_v18  ;;  %v467_v18 = vsub.f32 %v2395_v51, %v2404_v22  ;;  %586 = vmatpush.xpose.msra.mxu1 %v585_v57  ;;  %v3054_v57 = vand.u32 4294901760, %v2415_v11 }
  0x66   : > { %1000 = vmatpush.xpose.msrb.mxu3 %v999_v50  ;;  %660 = vmatmul.f32.vlgmr.msra.gmra.mxu2 %v2395_v51 }
  0x67   : > { %931 = vmatpush.xpose.msrb.mxu2 %v2309_v54  ;;  %v2426_v50 = vand.u32 4294901760, %v467_v18  ;;  %714 = vmatmul.f32.vlgmr.msra.gmra.mxu3 %v2404_v22  ;;  %v907_v18 = vsel %vm371_vm0, %v874_v49, 0  ;;  %v1017_v49 = vand.u32 4294901760, %v1016_v38  ;;  %v872_v38 = vld [vmem:[%s2122_s8 + $0x30] sm:$0xff] }
  0x68   : > { %v2459_v31 = vand.u32 4294901760, %v907_v18 }
  0x69   : > { %743 = vmatpush.xpose.msrb.mxu0 %v505_v19  ;;  %v873_v19 = vld [vmem:[%s2122_s8 + $0x38] sm:$0xff]  ;;  %592 = vmatpush.xpose.msra.mxu1 %v591_v46  ;;  %v1022_v46 = vsub.f32 %v2415_v11, %v3054_v57  ;;  %v3059_v57 = vand.u32 4294901760, %v2457_v2 }
  0x6a   : > { %1006 = vmatpush.xpose.msrb.mxu3 %v1005_v30  ;;  %469 = vmatmul.f32.vlgmr.msra.gmra.mxu0 %v2426_v50  ;;  %v2451_v30 = vand.u32 4294901760, %v2446_v14  ;;  %v904_v56 = vsel %vm371_vm0, %v873_v19, 0  ;;  %v3074_v19 = vand.u32 4294901760, %v2176_v25  ;;  %v2483_v63 = vsub.f32 %v907_v18, %v2459_v31  ;;  %v871_v18 = vld [vmem:[%s2122_s8 + $0x28] sm:$0xff] }
  0x6b   : > { %933 = vmatpush.xpose.msrb.mxu2 %v2325_v5  ;;  %v2485_v26 = vand.u32 4294901760, %v904_v56 }
  0x6c   : > { %3072 = vst [vmem:[#allocation9_spill] sm:$0xff] %v2451_v30  ;;  %v475_v15 = vsub.f32 %v2446_v14, %v2451_v30  ;;  %594 = vmatmul.f32.vlgmr.msra.gmra.mxu1 %v2381_v16 }
  0x6d   : > { %747 = vmatpush.xpose.msrb.mxu0 %v511_v24  ;;  %818 = vmatpush.xpose.msrb.mxu1 %v2138_v8  ;;  %v353_v24 = vld [vmem:[%s2102_s17 + $0x10] sm:$0xff] }
  0x6e   : > { %1012 = vmatpush.xpose.msrb.mxu3 %v1011_v60  ;;  %v379_v8 = vsel %vm371_vm0, %v353_v24, 0  ;;  %v2473_v13 = vand.u32 4294901760, %v475_v15  ;;  %v1023_v24 = vand.u32 4294901760, %v1022_v46  ;;  %v3075_v15 = vand.u32 4294901760, %v2441_v43  ;;  %665 = vmatmul.f32.gmra.mxu2 %v2446_v14 }
  0x6f   : > { %935 = vmatpush.xpose.msrb.mxu2 %v2347_v40  ;;  %v2475_v60 = vand.u32 4294901760, %v379_v8  ;;  %720 = vmatmul.f32.gmra.mxu3 %v2451_v30  ;;  %v1034_v46 = vsub.f32 %v2457_v2, %v3059_v57 }
  0x70   : > { %v1028_v22 = vsub.f32 %v2441_v43, %v3075_v15 }
  0x71   : > { %751 = vmatpush.xpose.msrb.mxu0 %v3074_v19  ;;  %820 = vmatpush.xpose.msrb.mxu1 %v2140_v9  ;;  %v2492_v25 = vsub.f32 %v379_v8, %v2475_v60  ;;  %v901_v9 = vsel %vm371_vm0, %v872_v38, 0  ;;  %v2509_v38 = vsub.f32 %v904_v56, %v2485_v26  ;;  %v1035_v8 = vand.u32 4294901760, %v1034_v46 }
  0x72   : > { %1018 = vmatpush.xpose.msrb.mxu3 %v1017_v49  ;;  %477 = vmatmul.f32.gmra.mxu0 %v2473_v13  ;;  %v3078_v49 = vand.u32 4294901760, %v2189_v33  ;;  %v1029_v15 = vand.u32 4294901760, %v1028_v22  ;;  %v2511_v30 = vand.u32 4294901760, %v901_v9  ;;  %v354_v33 = vld [vmem:[%s2102_s17 + $0x18] sm:$0xff]  ;;  %v3079_v22 = vand.u32 4294901760, %v2202_v39 }
  0x73   : > { %3076 = vst [vmem:[#allocation11_spill] sm:$0xff] %v2492_v25  ;;  %937 = vmatpush.xpose.msrb.mxu2 %v2366_v21  ;;  %v2498_v19 = vand.u32 4294901760, %v2492_v25  ;;  %v382_v57 = vsel %vm371_vm0, %v354_v33, 0  ;;  %v3065_v2 = vand.u32 4294901760, %v2509_v38 }
  0x74   : > { %598 = vmatmul.f32.gmra.mxu1 %v2428_v4 }
  0x75   : > { %3077 = vst [vmem:[#allocation12_spill] sm:$0xff] %v2498_v19  ;;  %755 = vmatpush.xpose.msrb.mxu0 %v3078_v49  ;;  %822 = vmatpush.xpose.msrb.mxu1 %v2142_v10  ;;  %v483_v14 = vsub.f32 %v2492_v25, %v2498_v19  ;;  %v898_v10 = vsel %vm371_vm0, %v871_v18, 0  ;;  %v870_v49 = vld [vmem:[%s2122_s8 + $0x20] sm:$0xff]  ;;  %v3080_v18 = vand.u32 4294901760, %v2483_v63 }
  0x76   : > { %1024 = vmatpush.xpose.msrb.mxu3 %v1023_v24  ;;  %v2523_v24 = vand.u32 4294901760, %v382_v57  ;;  %v2536_v33 = vand.u32 4294901760, %v898_v10  ;;  %670 = vmatmul.f32.gmra.mxu2 %v2492_v25 }
  0x77   : > { %939 = vmatpush.xpose.msrb.mxu2 %v2392_v41  ;;  %v2521_v56 = vand.u32 4294901760, %v483_v14  ;;  %726 = vmatmul.f32.gmra.mxu3 %v2498_v19  ;;  %v1040_v51 = vsub.f32 %v2483_v63, %v3080_v18  ;;  %v2534_v14 = vsub.f32 %v901_v9, %v2511_v30  ;;  %v895_v19 = vsel %vm371_vm0, %v870_v49, 0 }
  0x78   : > { %v2541_v39 = vsub.f32 %v382_v57, %v2523_v24  ;;  %v3081_v9 = vand.u32 4294901760, %v2209_v42  ;;  %v2552_v49 = vand.u32 4294901760, %v895_v19  ;;  %v1046_v57 = vsub.f32 %v2509_v38, %v3065_v2  ;;  %v868_v42 = vld [vmem:[%s2122_s8 + $0x10] sm:$0xff] }
  0x79   : > { %759 = vmatpush.xpose.msrb.mxu0 %v3079_v22  ;;  %824 = vmatpush.xpose.msrb.mxu1 %v2145_v12  ;;  %v869_v12 = vld [vmem:[%s2122_s8 + $0x18] sm:$0xff]  ;;  %v3066_v22 = vand.u32 4294901760, %v2534_v14  ;;  %v2559_v18 = vsub.f32 %v898_v10, %v2536_v33 }
  0x7a   : > { %1030 = vmatpush.xpose.msrb.mxu3 %v1029_v15  ;;  %485 = vmatmul.f32.gmra.mxu0 %v2521_v56  ;;  %v2546_v46 = vand.u32 4294901760, %v2541_v39  ;;  %v1041_v15 = vand.u32 4294901760, %v1040_v51  ;;  %v2574_v10 = vsub.f32 %v895_v19, %v2552_v49  ;;  %v3083_v19 = vand.u32 4294901760, %v2245_v61 }
  0x7b   : > { %941 = vmatpush.xpose.msrb.mxu2 %v2417_v37  ;;  %v3067_v2 = vand.u32 4294901760, %v2559_v18 }
  0x7c   : > { %v491_v25 = vsub.f32 %v2541_v39, %v2546_v46  ;;  %602 = vmatmul.f32.gmra.mxu1 %v2475_v60 }
  0x7d   : > { %763 = vmatpush.xpose.msrb.mxu0 %v3081_v9  ;;  %826 = vmatpush.xpose.msrb.mxu1 %v2163_v20  ;;  %v892_v20 = vsel %vm371_vm0, %v869_v12, 0  ;;  %v1047_v9 = vand.u32 4294901760, %v1046_v57  ;;  %v1052_v12 = vsub.f32 %v2534_v14, %v3066_v22 }
  0x7e   : > { %1036 = vmatpush.xpose.msrb.mxu3 %v1035_v8  ;;  %v2567_v51 = vand.u32 4294901760, %v491_v25  ;;  %v3082_v8 = vand.u32 4294901760, %v2230_v53  ;;  %v2580_v25 = vand.u32 4294901760, %v892_v20  ;;  %v867_v53 = vld [vmem:[%s2122_s8 + $0x8] sm:$0xff]  ;;  %675 = vmatmul.f32.gmra.mxu2 %v2541_v39 }
  0x7f   : > { %943 = vmatpush.xpose.msrb.mxu2 %v2436_v32  ;;  %732 = vmatmul.f32.gmra.mxu3 %v2546_v46  ;;  %v1053_v57 = vand.u32 4294901760, %v1052_v12  ;;  %v886_v61 = vsel %vm371_vm0, %v867_v53, 0 }
  0x80   : > { %v2595_v22 = vsub.f32 %v892_v20, %v2580_v25  ;;  %v2613_v53 = vand.u32 4294901760, %v886_v61 }
  0x81   : > { %767 = vmatpush.xpose.msrb.mxu0 %v3082_v8  ;;  %828 = vmatpush.xpose.msrb.mxu1 %v2180_v28  ;;  %v889_v28 = vsel %vm371_vm0, %v868_v42, 0  ;;  %v1058_v8 = vsub.f32 %v2559_v18, %v3067_v2 }
  0x82   : > { %1042 = vmatpush.xpose.msrb.mxu3 %v1041_v15  ;;  %493 = vmatmul.f32.gmra.mxu0 %v2567_v51  ;;  %v3068_v15 = vand.u32 4294901760, %v2574_v10  ;;  %v2597_v42 = vand.u32 4294901760, %v889_v28  ;;  %v1069_v12 = vand.u32 4294901760, %v2595_v22 }
  0x83   : > { %945 = vmatpush.xpose.msrb.mxu2 %v2459_v31  ;;  %v1059_v20 = vand.u32 4294901760, %v1058_v8  ;;  %v2625_v8 = vsub.f32 %v886_v61, %v2613_v53 }
  0x84   : > { %606 = vmatmul.f32.gmra.mxu1 %v2523_v24  ;;  %v2611_v2 = vsub.f32 %v889_v28, %v2597_v42 }
  0x85   : > { %771 = vmatpush.xpose.msrb.mxu0 %v3083_v19  ;;  %830 = vmatpush.xpose.msrb.mxu1 %v2194_v35  ;;  %v866_v35 = vld [vmem:[%s2122_s8] sm:$0xff]  ;;  %v3084_v19 = vand.u32 4294901760, %v2258_v3 }
  0x86   : > { %1048 = vmatpush.xpose.msrb.mxu3 %v1047_v9  ;;  %v1064_v9 = vsub.f32 %v2574_v10, %v3068_v15  ;;  %v883_v3 = vsel %vm371_vm0, %v866_v35, 0  ;;  %v1075_v28 = vand.u32 4294901760, %v2611_v2 }
  0x87   : > { %947 = vmatpush.xpose.msrb.mxu2 %v2485_v26  ;;  %v2627_v15 = vand.u32 4294901760, %v883_v3 }
  0x88   : > { %v1076_v35 = vsub.f32 %v2611_v2, %v1075_v28 }
  0x89   : > { %775 = vmatpush.xpose.msrb.mxu0 %v3084_v19  ;;  %832 = vmatpush.xpose.msrb.mxu1 %v2215_v45  ;;  %v3085_v19 = vand.u32 4294901760, %v2272_v17  ;;  %v1065_v45 = vand.u32 4294901760, %v1064_v9  ;;  %v3086_v17 = vand.u32 4294901760, %v2279_v23  ;;  %v1081_v9 = vand.u32 4294901760, %v2625_v8 }
  0x8a   : > { %1054 = vmatpush.xpose.msrb.mxu3 %v1053_v57  ;;  %v1070_v57 = vsub.f32 %v2595_v22, %v1069_v12  ;;  %v2638_v61 = vsub.f32 %v883_v3, %v2627_v15  ;;  %v3088_v3 = vand.u32 4294901760, %v2321_v1  ;;  %v3090_v1 = vand.u32 4294901760, %v2358_v55 }
  0x8b   : > { %949 = vmatpush.xpose.msrb.mxu2 %v2511_v30  ;;  %v1082_v23 = vsub.f32 %v2625_v8, %v1081_v9  ;;  %v2041_v55 = vmov 0  }
  0x8c   : > { %1987 = vset.pattern.permute.xlu0 %v2041_v55  ;;  %1988 = vset.pattern.permute.xlu1 %v2041_v55 }
  0x8d   : > { %779 = vmatpush.xpose.msrb.mxu0 %v3085_v19  ;;  %834 = vmatpush.xpose.msrb.mxu1 %v2227_v52  ;;  %v1071_v52 = vand.u32 4294901760, %v1070_v57  ;;  %v1087_v19 = vand.u32 4294901760, %v2638_v61 }
  0x8e   : > { %1060 = vmatpush.xpose.msrb.mxu3 %v1059_v20  ;;  %v3087_v20 = vand.u32 4294901760, %v2303_v48  ;;  %v1083_v48 = vand.u32 4294901760, %v1082_v23 }
  0x8f   : > { %951 = vmatpush.xpose.msrb.mxu2 %v2536_v33 }
  0x91   : > { %783 = vmatpush.xpose.msrb.mxu0 %v3086_v17  ;;  %836 = vmatpush.xpose.msrb.mxu1 %v2241_v59  ;;  %v1077_v59 = vand.u32 4294901760, %v1076_v35 }
  0x92   : > { %1066 = vmatpush.xpose.msrb.mxu3 %v1065_v45  ;;  %v3089_v45 = vand.u32 4294901760, %v2341_v34  ;;  %v3099_v34 = vand.u32 4294901760, %v2483_v63 }
  0x93   : > { %953 = vmatpush.xpose.msrb.mxu2 %v2552_v49 }
  0x95   : > { %787 = vmatpush.xpose.msrb.mxu0 %v3087_v20  ;;  %838 = vmatpush.xpose.msrb.mxu1 %v2250_v0  ;;  %v1088_v0 = vsub.f32 %v2638_v61, %v1087_v19 }
  0x96   : > { %1072 = vmatpush.xpose.msrb.mxu3 %v1071_v52 }
  0x97   : > { %955 = vmatpush.xpose.msrb.mxu2 %v2580_v25  ;;  %v1089_v57 = vand.u32 4294901760, %v1088_v0 }
  0x99   : > { %791 = vmatpush.xpose.msrb.mxu0 %v3088_v3  ;;  %840 = vmatpush.xpose.msrb.mxu1 %v2264_v6  ;;  %v3091_v6 = vand.u32 4294901760, %v2329_v7 }
  0x9a   : > { %1078 = vmatpush.xpose.msrb.mxu3 %v1077_v59 }
  0x9b   : > { %957 = vmatpush.xpose.msrb.mxu2 %v2597_v42 }
  0x9d   : > { %795 = vmatpush.xpose.msrb.mxu0 %v3089_v45  ;;  %842 = vmatpush.xpose.msrb.mxu1 %v2285_v29  ;;  %v3092_v29 = vand.u32 4294901760, %v2345_v36  ;;  %v1480_v45 = vld [vmem:[%s2127_s14 + $0x20] sm:$0xff] }
  0x9e   : > { %1084 = vmatpush.xpose.msrb.mxu3 %v1083_v48 }
  0x9f   : > { %959 = vmatpush.xpose.msrb.mxu2 %v2613_v53 }
  0xa1   : > { %799 = vmatpush.xpose.msrb.mxu0 %v3090_v1  ;;  %844 = vmatpush.xpose.msrb.mxu1 %v2300_v47  ;;  %v3093_v47 = vand.u32 4294901760, %v2364_v58 }
  0xa2   : > { %1090 = vmatpush.xpose.msrb.mxu3 %v1089_v57 }
  0xa3   : > { %961 = vmatpush.xpose.msrb.mxu2 %v2627_v15 }
  0xa4   : > { %801 = vmatmul.f32.vlgmr.msrb.gmra.mxu0 %v2381_v16 }
  0xa5   : > { %1110 = vmatpush.xpose.msra.mxu0 %v2329_v7  ;;  %846 = vmatpush.xpose.msrb.mxu1 %v2317_v62  ;;  %v3095_v62 = vand.u32 4294901760, %v2415_v11  ;;  %v3097_v7 = vld [vmem:[#allocation10_spill] sm:$0xff] }
  0xa6   : > { %1316 = vmatpush.xpose.msra.mxu3 %v2309_v54  ;;  %967 = vmatmul.f32.vlgmr.msrb.gmra.mxu2 %v2426_v50  ;;  %v3106_v50 = vld [vmem:[#allocation7_spill] sm:$0xff] }
  0xa7   : > { %1237 = vmatpush.xpose.msra.mxu2 %v3091_v6  ;;  %1092 = vmatmul.f32.vlgmr.msrb.gmra.mxu3 %v2381_v16 }
  0xa9   : > { %1113 = vmatpush.xpose.msra.mxu0 %v2345_v36  ;;  %848 = vmatpush.xpose.msrb.mxu1 %v2337_v27  ;;  %v3098_v27 = vand.u32 4294901760, %v3097_v7  ;;  %v3100_v36 = vand.u32 4294901760, %v2509_v38 }
  0xaa   : > { %1318 = vmatpush.xpose.msra.mxu3 %v2325_v5 }
  0xab   : > { %1241 = vmatpush.xpose.msra.mxu2 %v3092_v29  ;;  %v2813_v29 = vand.u32 4294901760, %v1480_v45 }
  0xac   : > { %850 = vmatmul.f32.vlgmr.msrb.gmra.mxu1 %v2381_v16  ;;  %805 = vmatmul.f32.gmra.mxu0 %v2428_v4 }
  0xad   : > { %1116 = vmatpush.xpose.msra.mxu0 %v2364_v58  ;;  %1178 = vmatpush.xpose.msra.mxu1 %v2309_v54  ;;  %v3094_v54 = vand.u32 4294901760, %v2389_v44  ;;  %v1449_v58 = vld [vmem:[%s2107_s20 + $0x8] sm:$0xff] }
  0xae   : > { %1320 = vmatpush.xpose.msra.mxu3 %v2347_v40  ;;  %975 = vmatmul.f32.gmra.mxu2 %v2473_v13 }
  0xaf   : > { %1245 = vmatpush.xpose.msra.mxu2 %v3093_v47  ;;  %1096 = vmatmul.f32.gmra.mxu3 %v2428_v4 }
  0xb1   : > { %1119 = vmatpush.xpose.msra.mxu0 %v2389_v44  ;;  %1180 = vmatpush.xpose.msra.mxu1 %v2325_v5  ;;  %v3096_v5 = vand.u32 4294901760, %v2441_v43  ;;  %v1450_v44 = vld [vmem:[%s2107_s20 + $0x10] sm:$0xff] }
  0xb2   : > { %1322 = vmatpush.xpose.msra.mxu3 %v2366_v21  ;;  %1464 = vperm.xlu1 %1988, %v1450_v44  }
  0xb3   : > { %1249 = vmatpush.xpose.msra.mxu2 %v3094_v54 }
  0xb4   : > { %854 = vmatmul.f32.gmra.mxu1 %v2428_v4  ;;  %809 = vmatmul.f32.gmra.mxu0 %v2475_v60 }
  0xb5   : > { %1122 = vmatpush.xpose.msra.mxu0 %v2415_v11  ;;  %1182 = vmatpush.xpose.msra.mxu1 %v2347_v40  ;;  %v3103_v40 = vand.u32 4294901760, %v2574_v10  ;;  %v3105_v11 = vld [vmem:[#allocation8_spill] sm:$0xff] }
  0xb6   : > { %1324 = vmatpush.xpose.msra.mxu3 %v2392_v41  ;;  %983 = vmatmul.f32.gmra.mxu2 %v2521_v56 }
  0xb7   : > { %1253 = vmatpush.xpose.msra.mxu2 %v3095_v62  ;;  %1100 = vmatmul.f32.gmra.mxu3 %v2475_v60 }
  0xb9   : > { %1125 = vmatpush.xpose.msra.mxu0 %v2441_v43  ;;  %1184 = vmatpush.xpose.msra.mxu1 %v2366_v21  ;;  %v3104_v21 = vld [vmem:[#allocation6_spill] sm:$0xff]  ;;  %v3107_v43 = vld [vmem:[#allocation11_spill] sm:$0xff] }
  0xba   : > { %1326 = vmatpush.xpose.msra.mxu3 %v2417_v37 }
  0xbb   : > { %1257 = vmatpush.xpose.msra.mxu2 %v3096_v5 }
  0xbc   : > { %858 = vmatmul.f32.gmra.mxu1 %v2475_v60  ;;  %813 = vmatmul.f32.gmra.mxu0 %v2523_v24 }
  0xbd   : > { %1128 = vmatpush.xpose.msra.mxu0 %v3097_v7  ;;  %1186 = vmatpush.xpose.msra.mxu1 %v2392_v41  ;;  %v1448_v41 = vld [vmem:[%s2107_s20] sm:$0xff] }
  0xbe   : > { %1328 = vmatpush.xpose.msra.mxu3 %v2436_v32  ;;  %991 = vmatmul.f32.gmra.mxu2 %v2567_v51 }
  0xbf   : > { %1261 = vmatpush.xpose.msra.mxu2 %v3098_v27  ;;  %1104 = vmatmul.f32.gmra.mxu3 %v2523_v24 }
  0xc0   : > { %1454 = vperm.xlu0 %1987, %v1448_v41  }
  0xc1   : > { %1131 = vmatpush.xpose.msra.mxu0 %v2483_v63  ;;  %1188 = vmatpush.xpose.msra.mxu1 %v2417_v37  ;;  %v3101_v37 = vand.u32 4294901760, %v2534_v14  ;;  %v1451_v63 = vld [vmem:[%s2107_s20 + $0x18] sm:$0xff] }
  0xc2   : > { %1330 = vmatpush.xpose.msra.mxu3 %v2459_v31  ;;  %1469 = vperm.xlu1 %1988, %v1451_v63   ;;  %v1478_v63 = vld [vmem:[%s2127_s14 + $0x10] sm:$0xff] }
  0xc3   : > { %1265 = vmatpush.xpose.msra.mxu2 %v3099_v34  ;;  %v1568_v34 = vsub.f32 %v1480_v45, %v2813_v29 }
  0xc4   : > { %862 = vmatmul.f32.gmra.mxu1 %v2523_v24 }
  0xc5   : > { %1134 = vmatpush.xpose.msra.mxu0 %v2509_v38  ;;  %1190 = vmatpush.xpose.msra.mxu1 %v2436_v32  ;;  %v3102_v32 = vand.u32 4294901760, %v2559_v18 }
  0xc6   : > { %1332 = vmatpush.xpose.msra.mxu3 %v2485_v26 }
  0xc7   : > { %1269 = vmatpush.xpose.msra.mxu2 %v3100_v36  ;;  %v1479_v36 = vld [vmem:[%s2127_s14 + $0x18] sm:$0xff] }
  0xc8   : > { %1459 = vperm.xlu0 %1987, %v1449_v58   ;;  %v2824_v41 = vand.u32 4294901760, %v1479_v36 }
  0xc9   : > { %1137 = vmatpush.xpose.msra.mxu0 %v2534_v14  ;;  %1192 = vmatpush.xpose.msra.mxu1 %v2459_v31 }
  0xca   : > { %1334 = vmatpush.xpose.msra.mxu3 %v2511_v30  ;;  %v1574_v44 = vsub.f32 %v1479_v36, %v2824_v41 }
  0xcb   : > { %1273 = vmatpush.xpose.msra.mxu2 %v3101_v37 }
  0xcd   : > { %1140 = vmatpush.xpose.msra.mxu0 %v2559_v18  ;;  %1194 = vmatpush.xpose.msra.mxu1 %v2485_v26  ;;  %v1483_v18 = vld [vmem:[%s2127_s14 + $0x38] sm:$0xff] }
  0xce   : > { %1336 = vmatpush.xpose.msra.mxu3 %v2536_v33  ;;  %v2787_v51 = vand.u32 4294901760, %v1483_v18 }
  0xcf   : > { %1277 = vmatpush.xpose.msra.mxu2 %v3102_v32 }
  0xd1   : > { %1143 = vmatpush.xpose.msra.mxu0 %v2574_v10  ;;  %1196 = vmatpush.xpose.msra.mxu1 %v2511_v30  ;;  %v3108_v30 = vld [vmem:[#allocation9_spill] sm:$0xff]  ;;  %v1550_v10 = vsub.f32 %v1483_v18, %v2787_v51 }
  0xd2   : > { %1338 = vmatpush.xpose.msra.mxu3 %v2552_v49 }
  0xd3   : > { %1281 = vmatpush.xpose.msra.mxu2 %v3103_v40  ;;  %v2822_v40 = vand.u32 4294901760, %v1568_v34 }
  0xd5   : > { %1146 = vmatpush.xpose.msra.mxu0 %v2595_v22  ;;  %1198 = vmatpush.xpose.msra.mxu1 %v2536_v33 }
  0xd6   : > { %1340 = vmatpush.xpose.msra.mxu3 %v2580_v25 }
  0xd7   : > { %1285 = vmatpush.xpose.msra.mxu2 %v1069_v12 }
  0xd9   : > { %1149 = vmatpush.xpose.msra.mxu0 %v2611_v2  ;;  %1200 = vmatpush.xpose.msra.mxu1 %v2552_v49 }
  0xda   : > { %1342 = vmatpush.xpose.msra.mxu3 %v2597_v42 }
  0xdb   : > { %1289 = vmatpush.xpose.msra.mxu2 %v1075_v28 }
  0xdd   : > { %1152 = vmatpush.xpose.msra.mxu0 %v2625_v8  ;;  %1202 = vmatpush.xpose.msra.mxu1 %v2580_v25 }
  0xde   : > { %1344 = vmatpush.xpose.msra.mxu3 %v2613_v53 }
  0xdf   : > { %1293 = vmatpush.xpose.msra.mxu2 %v1081_v9  ;;  %v1481_v9 = vld [vmem:[%s2127_s14 + $0x28] sm:$0xff] }
  0xe0   : > { %v2804_v59 = vand.u32 4294901760, %v1481_v9 }
  0xe1   : > { %1155 = vmatpush.xpose.msra.mxu0 %v2638_v61  ;;  %1204 = vmatpush.xpose.msra.mxu1 %v2597_v42  ;;  %v1482_v42 = vld [vmem:[%s2127_s14 + $0x30] sm:$0xff] }
  0xe2   : > { %1346 = vmatpush.xpose.msra.mxu3 %v2627_v15  ;;  %v2795_v28 = vand.u32 4294901760, %v1482_v42  ;;  %v1562_v0 = vsub.f32 %v1481_v9, %v2804_v59 }
  0xe3   : > { %1297 = vmatpush.xpose.msra.mxu2 %v1087_v19 }
  0xe4   : > { %1158 = vmatmul.f32.vlgmr.msra.gmra.mxu0 %v3104_v21  ;;  %v1556_v35 = vsub.f32 %v1482_v42, %v2795_v28  ;;  %v2811_v6 = vand.u32 4294901760, %v1562_v0  ;;  %v1570_v21 = vsub.f32 %v1568_v34, %v2822_v40 }
  0xe5   : > { %1206 = vmatpush.xpose.msra.mxu1 %v2613_v53  ;;  %1348 = vmatmul.f32.vlgmr.msra.gmra.mxu3 %v2381_v16  ;;  %v2793_v53 = vand.u32 4294901760, %v1550_v10 }
  0xe6   : > { %1299 = vmatmul.f32.vlgmr.msra.gmra.mxu2 %v2381_v16  ;;  %v3109_v16 = vld [vmem:[#allocation12_spill] sm:$0xff]  ;;  %1676 = vmatpush.xpose.msrb.mxu3 %v2787_v51  ;;  %v2802_v20 = vand.u32 4294901760, %v1556_v35  ;;  %v1564_v27 = vsub.f32 %v1562_v0, %v2811_v6 }
  0xe7   : > { %1493 = vmatpush.xpose.msrb.mxu0 %v2787_v51  ;;  %1624 = vmatpush.xpose.msrb.mxu2 %v1550_v10  ;;  %v1552_v52 = vsub.f32 %v1550_v10, %v2793_v53 }
  0xe8   : > { %v1558_v48 = vsub.f32 %v1556_v35, %v2802_v20  ;;  %v1565_v32 = vand.u32 4294901760, %v1564_v27 }
  0xe9   : > { %1208 = vmatpush.xpose.msra.mxu1 %v2627_v15  ;;  %v595_v2 = vpop.f32.mrf.mxu1  ;;  %v661_v38 = vpop.f32.mrf.mxu2  ;;  %v1553_v61 = vand.u32 4294901760, %v1552_v52 }
  0xea   : > { %v715_v56 = vpop.f32.mrf.mxu3  ;;  %1678 = vmatpush.xpose.msrb.mxu3 %v2795_v28  ;;  %v1559_v1 = vand.u32 4294901760, %v1558_v48 }
  0xeb   : > { %1495 = vmatpush.xpose.msrb.mxu0 %v2795_v28  ;;  %1627 = vmatpush.xpose.msrb.mxu2 %v1556_v35 }
  0xec   : > { %1163 = vmatmul.f32.gmra.mxu0 %v3105_v11  ;;  %1212 = vmatmul.f32.vlgmr.msra.gmra.mxu1 %v3106_v50 }
  0xed   : > { %1352 = vmatmul.f32.gmra.mxu3 %v2428_v4  ;;  %1554 = vmatpush.xpose.msrb.mxu1 %v1553_v61 }
  0xee   : > { %1303 = vmatmul.f32.gmra.mxu2 %v2428_v4  ;;  %v470_v4 = vpop.f32.mrf.mxu0  ;;  %1680 = vmatpush.xpose.msrb.mxu3 %v2804_v59 }
  0xef   : > { %v596_v22 = vadd.f32 %v595_v2, %v470_v4  ;;  %1497 = vmatpush.xpose.msrb.mxu0 %v2804_v59  ;;  %1630 = vmatpush.xpose.msrb.mxu2 %v1562_v0 }
  0xf1   : > { %v599_v26 = vpop.f32.mrf.mxu1  ;;  %v666_v33 = vpop.f32.mrf.mxu2  ;;  %1560 = vmatpush.xpose.msrb.mxu1 %v1559_v1 }
  0xf2   : > { %1682 = vmatpush.xpose.msrb.mxu3 %v2813_v29 }
  0xf3   : > { %1499 = vmatpush.xpose.msrb.mxu0 %v2813_v29  ;;  %1633 = vmatpush.xpose.msrb.mxu2 %v1568_v34 }
  0xf4   : > { %1168 = vmatmul.f32.gmra.mxu0 %v3107_v43  ;;  %1218 = vmatmul.f32.gmra.mxu1 %v3108_v30  ;;  %v1571_v43 = vand.u32 4294901760, %v1570_v21 }
  0xf5   : > { %1356 = vmatmul.f32.gmra.mxu3 %v2475_v60  ;;  %1566 = vmatpush.xpose.msrb.mxu1 %v1565_v32 }
  0xf6   : > { %1307 = vmatmul.f32.gmra.mxu2 %v2475_v60  ;;  %v478_v31 = vpop.f32.mrf.mxu0  ;;  %1684 = vmatpush.xpose.msrb.mxu3 %v2824_v41 }
  0xf7   : > { %v600_v8 = vadd.f32 %v599_v26, %v478_v31  ;;  %1501 = vmatpush.xpose.msrb.mxu0 %v2824_v41  ;;  %1636 = vmatpush.xpose.msrb.mxu2 %v1574_v44  ;;  %v2840_v31 = vand.u32 4294901760, %v1574_v44  ;;  %v2842_v26 = vand.u32 4294901760, %v1478_v63 }
  0xf9   : > { %v603_v60 = vpop.f32.mrf.mxu1  ;;  %v671_v25 = vpop.f32.mrf.mxu2  ;;  %v667_v19 = vadd.f32 %v666_v33, %v600_v8  ;;  %1572 = vmatpush.xpose.msrb.mxu1 %v1571_v43 }
  0xfa   : > { %1686 = vmatpush.xpose.msrb.mxu3 %v2842_v26 }
  0xfb   : > { %1503 = vmatpush.xpose.msrb.mxu0 %v2842_v26 }
  0xfc   : > { %1173 = vmatmul.f32.gmra.mxu0 %v2541_v39  ;;  %1224 = vmatmul.f32.gmra.mxu1 %v3109_v16  ;;  %v721_v39 = vpop.f32.mrf.mxu3 }
  0xfd   : > { %1360 = vmatmul.f32.gmra.mxu3 %v2523_v24  ;;  %v722_v54 = vadd.f32 %v721_v39, %v667_v19 }
  0xfe   : > { %1311 = vmatmul.f32.gmra.mxu2 %v2523_v24  ;;  %v486_v13 = vpop.f32.mrf.mxu0 }
  0xff   : > { %v604_v57 = vadd.f32 %v603_v60, %v486_v13  ;;  %v1477_v13 = vld [vmem:[%s2127_s14 + $0x8] sm:$0xff]  ;;  %v1576_v60 = vsub.f32 %v1574_v44, %v2840_v31 }
 0x101   : > { %v2784_v49 = vpop.f32.mrf.mxu1  ;;  %v676_v62 = vpop.f32.mrf.mxu2  ;;  %v672_v37 = vadd.f32 %v671_v25, %v604_v57  ;;  %v1476_v25 = vld [vmem:[%s2127_s14] sm:$0xff] }
 0x102   : > { %v2869_v9 = vand.u32 4294901760, %v1476_v25 }
 0x104   : > { %1230 = vmatmul.f32.gmra.mxu1 %v2546_v46  ;;  %v662_v46 = vadd.f32 %v661_v38, %v596_v22  ;;  %v727_v15 = vpop.f32.mrf.mxu3  ;;  %v1577_v22 = vand.u32 4294901760, %v1576_v60  ;;  %v1592_v48 = vsub.f32 %v1476_v25, %v2869_v9 }
 0x105   : > { %v728_v11 = vadd.f32 %v727_v15, %v672_v37 }
 0x106   : > { %v2782_v14 = vpop.f32.mrf.mxu0  ;;  %v716_v17 = vadd.f32 %v715_v56, %v662_v46  ;;  %1578 = vmatpush.xpose.msrb.mxu1 %v1577_v22  ;;  %v2878_v1 = vand.u32 4294901760, %v1592_v48 }
 0x107   : > { %v608_v30 = vadd.f32 %v2784_v49, %v2782_v14  ;;  %v1580_v14 = vsub.f32 %v1478_v63, %v2842_v26  ;;  %v2849_v49 = vand.u32 4294901760, %v1477_v13 }
 0x109   : > { %v677_v39 = vadd.f32 %v676_v62, %v608_v30  ;;  %v2852_v18 = vand.u32 4294901760, %v1580_v14  ;;  %1639 = vmatpush.xpose.msrb.mxu2 %v1580_v14  ;;  %v1586_v46 = vsub.f32 %v1477_v13, %v2849_v49  ;;  %1688 = vmatpush.xpose.msrb.mxu3 %v2849_v49 }
 0x10a   : > { %1505 = vmatpush.xpose.msrb.mxu0 %v2849_v49 }
 0x10b   : > { %v1582_v8 = vsub.f32 %v1580_v14, %v2852_v18  ;;  %v2867_v35 = vand.u32 4294901760, %v1586_v46 }
 0x10c   : > { %v733_v5 = vpop.f32.mrf.mxu3 }
 0x10d   : > { %v734_v15 = vadd.f32 %v733_v5, %v677_v39  ;;  %1642 = vmatpush.xpose.msrb.mxu2 %v1586_v46  ;;  %1690 = vmatpush.xpose.msrb.mxu3 %v2869_v9  ;;  %v1594_v5 = vsub.f32 %v1592_v48, %v2878_v1 }
 0x10e   : > { %1507 = vmatpush.xpose.msrb.mxu0 %v2869_v9 }
 0x10f   : > { %v1595_v27 = vand.u32 4294901760, %v1594_v5 }
 0x111   : > { %1967 = vmatpush.xpose.msra.mxu3 %v2787_v51  ;;  %1645 = vmatpush.xpose.msrb.mxu2 %v1592_v48 }
 0x112   : > { %1727 = vmatpush.xpose.msra.mxu0 %v2793_v53 }
 0x115   : > { %1959 = vmatpush.xpose.msra.mxu2 %v2793_v53  ;;  %1968 = vmatpush.xpose.msra.mxu3 %v2795_v28 }
 0x116   : > { %1731 = vmatpush.xpose.msra.mxu0 %v2802_v20 }
 0x119   : > { %1960 = vmatpush.xpose.msra.mxu2 %v2802_v20  ;;  %1969 = vmatpush.xpose.msra.mxu3 %v2804_v59 }
 0x11a   : > { %1735 = vmatpush.xpose.msra.mxu0 %v2811_v6 }
 0x11d   : > { %1961 = vmatpush.xpose.msra.mxu2 %v2811_v6  ;;  %1970 = vmatpush.xpose.msra.mxu3 %v2813_v29 }
 0x11e   : > { %1739 = vmatpush.xpose.msra.mxu0 %v2822_v40 }
 0x121   : > { %v802_v24 = vpop.f32.mrf.mxu0  ;;  %1962 = vmatpush.xpose.msra.mxu2 %v2822_v40  ;;  %1971 = vmatpush.xpose.msra.mxu3 %v2824_v41 }
 0x122   : > { %v803_v23 = vadd.f32 %v802_v24, %v716_v17  ;;  %1743 = vmatpush.xpose.msra.mxu0 %v2840_v31 }
 0x125   : > { %1963 = vmatpush.xpose.msra.mxu2 %v2840_v31  ;;  %1972 = vmatpush.xpose.msra.mxu3 %v2842_v26 }
 0x126   : > { %1747 = vmatpush.xpose.msra.mxu0 %v2852_v18 }
 0x129   : > { %v851_v12 = vpop.f32.mrf.mxu1  ;;  %v806_v3 = vpop.f32.mrf.mxu0  ;;  %1964 = vmatpush.xpose.msra.mxu2 %v2852_v18  ;;  %1973 = vmatpush.xpose.msra.mxu3 %v2849_v49 }
 0x12a   : > { %v2815_v47 = vadd.f32 %v851_v12, %v803_v23  ;;  %v807_v58 = vadd.f32 %v806_v3, %v722_v54  ;;  %v2836_v4 = vpop.f32.mrf.mxu2  ;;  %v2838_v2 = vpop.f32.mrf.mxu3  ;;  %v1583_v23 = vand.u32 4294901760, %v1582_v8  ;;  %v1588_v3 = vsub.f32 %v1586_v46, %v2867_v35  ;;  %1751 = vmatpush.xpose.msra.mxu0 %v2867_v35 }
 0x12b   : > { %v1094_v31 = vadd.f32 %v2838_v2, %v2836_v4 }
 0x12c   : > { %v1949_v55 = vmul.f32 -1.442695, %v2815_v47  ;;  %1584 = vmatpush.xpose.msrb.mxu1 %v1583_v23  ;;  %v1589_v57 = vand.u32 4294901760, %v1588_v3 }
 0x12d   : > { %1965 = vmatpush.xpose.msra.mxu2 %v2867_v35  ;;  %1974 = vmatpush.xpose.msra.mxu3 %v2869_v9 }
 0x12e   : > { %1989 = vpow2.f32 %v1949_v55  ;;  %1755 = vmatpush.xpose.msra.mxu0 %v2878_v1 }
 0x130   : > { %1590 = vmatpush.xpose.msrb.mxu1 %v1589_v57 }
 0x131   : > { %v855_v7 = vpop.f32.mrf.mxu1  ;;  %v810_v50 = vpop.f32.mrf.mxu0  ;;  %1966 = vmatpush.xpose.msra.mxu2 %v2878_v1 }
 0x132   : > { %v2834_v16 = vadd.f32 %v855_v7, %v807_v58  ;;  %v811_v38 = vadd.f32 %v810_v50, %v728_v11  ;;  %v2863_v17 = vpop.f32.mrf.mxu2  ;;  %v2865_v52 = vpop.f32.mrf.mxu3 }
 0x133   : > { %v1455_v35 = vpop.permute.xlu0 %1454 }
 0x134   : > { %v1950_v33 = vmul.f32 -1.442695, %v2834_v16  ;;  %v1990_v24 = vpop.eup %1989  ;;  %1596 = vmatpush.xpose.msrb.mxu1 %v1595_v27 }
 0x135   : > { %v2860_v42 = vadd.f32 1.0, %v1990_v24 }
 0x136   : > { %1991 = vpow2.f32 %v1950_v33 }
 0x137   : > { %1993 = vrcp.f32 %v2860_v42  ;;  %vm1385_vm2 = vweird.f32 %v2860_v42  ;;  %v1389_v30 = vand.u32 2147483647, %v2860_v42 }
 0x138   : > { %1782 = vmatpush.xpose.msra.mxu1 %v2787_v51 }
 0x139   : > { %v859_v56 = vpop.f32.mrf.mxu1  ;;  %v814_v12 = vpop.f32.mrf.mxu0  ;;  %vm1390_vm4 = vcmp.eq.f32.partialorder %v1389_v30, 8.507059e+37 }
 0x13a   : > { %v2855_v10 = vadd.f32 %v859_v56, %v811_v38  ;;  %v815_v19 = vadd.f32 %v814_v12, %v734_v15  ;;  %v2893_v36 = vpop.f32.mrf.mxu2  ;;  %v2895_v53 = vpop.f32.mrf.mxu3 }
 0x13c   : > { %v1951_v61 = vmul.f32 -1.442695, %v2855_v10  ;;  %v1992_v45 = vpop.eup %1991  ;;  %1784 = vmatpush.xpose.msra.mxu1 %v2795_v28 }
 0x13d   : > { %v2884_v62 = vadd.f32 1.0, %v1992_v45  ;;  %v2889_v7 = vpop.eup %1993 }
 0x13e   : > { %1995 = vpow2.f32 %v1951_v61  ;;  %v1381_v32 = vmul.f32 %v2889_v7, %v2860_v42  ;;  %vm1386_vm1 = vweird.f32 %v2889_v7 }
 0x13f   : > { %1997 = vrcp.f32 %v2884_v62  ;;  %vm2939_vm3 = vmor %vm1385_vm2, %vm1386_vm1  ;;  %v1406_v15 = vand.u32 2147483648, %v2884_v62  ;;  %vm1400_vm6 = vweird.f32 %v2884_v62  ;;  %v1404_v8 = vand.u32 2147483647, %v2884_v62 }
 0x140   : > { %v1382_v55 = vsub.f32 1.0, %v1381_v32  ;;  %1786 = vmatpush.xpose.msra.mxu1 %v2804_v59  ;;  %v1391_v59 = vand.u32 2147483648, %v2860_v42  ;;  %v1098_v42 = vadd.f32 %v2865_v52, %v2863_v17 }
 0x141   : > { %v863_v0 = vpop.f32.mrf.mxu1  ;;  %vm1405_vm8 = vcmp.eq.f32.partialorder %v1404_v8, 8.507059e+37 }
 0x142   : > { %v2882_v54 = vadd.f32 %v863_v0, %v815_v19  ;;  %v1383_v6 = vmul.f32 %v2889_v7, %v1382_v55  ;;  %v2917_v44 = vpop.f32.mrf.mxu2  ;;  %v2919_v63 = vpop.f32.mrf.mxu3  ;;  %v1392_v4 = vor.u32 1.1754944e-38, %v1391_v59 }
 0x144   : > { %v1952_v34 = vmul.f32 -1.442695, %v2882_v54  ;;  %v1996_v37 = vpop.eup %1995  ;;  %v1384_v50 = vadd.f32 %v2889_v7, %v1383_v6  ;;  %1788 = vmatpush.xpose.msra.mxu1 %v2813_v29 }
 0x145   : > { %v2904_v20 = vadd.f32 1.0, %v1996_v37  ;;  %v2909_v58 = vpop.eup %1997  ;;  %v1102_v37 = vadd.f32 %v2895_v53, %v2893_v36  ;;  %v1460_v36 = vpop.permute.xlu0 %1459 }
 0x146   : > { %1999 = vpow2.f32 %v1952_v34  ;;  %v1396_v21 = vmul.f32 %v2909_v58, %v2884_v62  ;;  %v1388_v38 = vsel %vm2939_vm3, %v2889_v7, %v1384_v50  ;;  %vm1401_vm5 = vweird.f32 %v2909_v58 }
 0x147   : > { %2001 = vrcp.f32 %v2904_v20  ;;  %v1393_v18 = vsel %vm1390_vm4, %v1392_v4, %v1388_v38  ;;  %vm1402_vm7 = vmor %vm1400_vm6, %vm1401_vm5  ;;  %vm1415_vm10 = vweird.f32 %v2904_v20  ;;  %v1106_v4 = vadd.f32 %v2919_v63, %v2917_v44 }
 0x148   : > { %v1397_v43 = vsub.f32 1.0, %v1396_v21  ;;  %1790 = vmatpush.xpose.msra.mxu1 %v2824_v41  ;;  %v1440_v12 = vmul.f32 %v1393_v18, %v2815_v47  ;;  %v1407_v47 = vor.u32 1.1754944e-38, %v1406_v15 }
 0x14a   : > { %v1398_v56 = vmul.f32 %v2909_v58, %v1397_v43 }
 0x14c   : > { %v2000_v51 = vpop.eup %1999  ;;  %v1399_v46 = vadd.f32 %v2909_v58, %v1398_v56  ;;  %1792 = vmatpush.xpose.msra.mxu1 %v2842_v26 }
 0x14d   : > { %v2924_v40 = vadd.f32 1.0, %v2000_v51  ;;  %v2927_v11 = vpop.eup %2001 }
 0x14e   : > { %v1411_v29 = vmul.f32 %v2927_v11, %v2904_v20  ;;  %v1403_v23 = vsel %vm1402_vm7, %v2909_v58, %v1399_v46  ;;  %vm1416_vm9 = vweird.f32 %v2927_v11  ;;  %v1419_v58 = vand.u32 2147483647, %v2904_v20  ;;  %v1465_v46 = vpop.permute.xlu1 %1464 }
 0x14f   : > { %2003 = vrcp.f32 %v2924_v40  ;;  %v1408_v1 = vsel %vm1405_vm8, %v1407_v47, %v1403_v23  ;;  %vm2983_vm11 = vmor %vm1415_vm10, %vm1416_vm9  ;;  %vm1430_vm14 = vweird.f32 %v2924_v40 }
 0x150   : > { %v1412_v24 = vsub.f32 1.0, %v1411_v29  ;;  %1794 = vmatpush.xpose.msra.mxu1 %v2849_v49  ;;  %v1421_v49 = vand.u32 2147483648, %v2904_v20  ;;  %v1441_v32 = vmul.f32 %v1408_v1, %v2834_v16  ;;  %vm1420_vm12 = vcmp.eq.f32.partialorder %v1419_v58, 8.507059e+37 }
 0x152   : > { %v1413_v26 = vmul.f32 %v2927_v11, %v1412_v24  ;;  %v1422_v50 = vor.u32 1.1754944e-38, %v1421_v49 }
 0x154   : > { %v1414_v62 = vadd.f32 %v2927_v11, %v1413_v26  ;;  %1796 = vmatpush.xpose.msra.mxu1 %v2869_v9 }
 0x155   : > { %v2959_v41 = vpop.eup %2003 }
 0x156   : > { %v1426_v19 = vmul.f32 %v2959_v41, %v2924_v40  ;;  %v1418_v9 = vsel %vm2983_vm11, %v2927_v11, %v1414_v62  ;;  %vm1431_vm13 = vweird.f32 %v2959_v41 }
 0x157   : > { %v1423_v29 = vsel %vm1420_vm12, %v1422_v50, %v1418_v9  ;;  %vm3004_vm15 = vmor %vm1430_vm14, %vm1431_vm13 }
 0x158   : > { %v1427_v7 = vsub.f32 1.0, %v1426_v19 }
 0x15a   : > { %v1428_v21 = vmul.f32 %v2959_v41, %v1427_v7 }
 0x15c   : > { %v1429_v11 = vadd.f32 %v2959_v41, %v1428_v21 }
 0x15e   : > { %v1433_v44 = vsel %vm3004_vm15, %v2959_v41, %v1429_v11 }
 0x161   : > { %v1159_v28 = vpop.f32.mrf.mxu0 }
 0x162   : > { %v1160_v60 = vadd.f32 %v1159_v28, %v1094_v31 }
 0x168   : > { %v1349_v14 = vpop.f32.mrf.mxu3 }
 0x169   : > { %v1164_v2 = vpop.f32.mrf.mxu0  ;;  %v1213_v33 = vpop.f32.mrf.mxu1 }
 0x16a   : > { %v1214_v39 = vadd.f32 %v1213_v33, %v1160_v60  ;;  %v1300_v22 = vpop.f32.mrf.mxu2  ;;  %v1165_v3 = vadd.f32 %v1164_v2, %v1098_v42  ;;  %v1442_v33 = vmul.f32 %v1423_v29, %v2855_v10 }
 0x16c   : > { %v1301_v25 = vadd.f32 %v1300_v22, %v1214_v39  ;;  %v1434_v39 = vand.u32 2147483647, %v2924_v40 }
 0x16e   : > { %v1350_v61 = vadd.f32 %v1349_v14, %v1301_v25  ;;  %v1436_v14 = vand.u32 2147483648, %v2924_v40  ;;  %vm1435_vm1 = vcmp.eq.f32.partialorder %v1434_v39, 8.507059e+37 }
 0x170   : > { %v1444_v17 = vmul.f32 %v1440_v12, %v1350_v61  ;;  %v1353_v52 = vpop.f32.mrf.mxu3  ;;  %v1437_v40 = vor.u32 1.1754944e-38, %v1436_v14 }
 0x171   : > { %v1219_v48 = vpop.f32.mrf.mxu1  ;;  %v1169_v5 = vpop.f32.mrf.mxu0 }
 0x172   : > { %v1472_v0 = vmul.f32 %v1455_v35, %v1444_v17  ;;  %v1220_v45 = vadd.f32 %v1219_v48, %v1165_v3  ;;  %v1304_v57 = vpop.f32.mrf.mxu2  ;;  %v1170_v53 = vadd.f32 %v1169_v5, %v1102_v37  ;;  %v1438_v61 = vsel %vm1435_vm1, %v1437_v40, %v1433_v44 }
 0x173   : > { %v1443_v17 = vmul.f32 %v1438_v61, %v2882_v54 }
 0x174   : > { %v2975_v27 = vand.u32 4294901760, %v1472_v0  ;;  %v1305_v34 = vadd.f32 %v1304_v57, %v1220_v45 }
 0x176   : > { %v1509_v51 = vsub.f32 %v1472_v0, %v2975_v27  ;;  %v1354_v6 = vadd.f32 %v1353_v52, %v1305_v34  ;;  %1598 = vmatmul.f32.vlgmr.msrb.gmra.mxu1 %v2975_v27  ;;  %v1470_v0 = vpop.permute.xlu1 %1469 }
 0x178   : > { %v1445_v16 = vmul.f32 %v1441_v32, %v1354_v6  ;;  %1648 = vmatmul.f32.vlgmr.msrb.gmra.mxu2 %v1509_v51  ;;  %v1510_v28 = vand.u32 4294901760, %v1509_v51  ;;  %v1357_v59 = vpop.f32.mrf.mxu3 }
 0x179   : > { %v1225_v43 = vpop.f32.mrf.mxu1  ;;  %v1174_v2 = vpop.f32.mrf.mxu0 }
 0x17a   : > { %v1473_v20 = vmul.f32 %v1460_v36, %v1445_v16  ;;  %v1226_v30 = vadd.f32 %v1225_v43, %v1170_v53  ;;  %1694 = vmatmul.f32.vlgmr.msrb.gmra.mxu3 %v1510_v28  ;;  %v1308_v31 = vpop.f32.mrf.mxu2  ;;  %v1511_v13 = vsub.f32 %v1509_v51, %v1510_v28  ;;  %v1175_v63 = vadd.f32 %v1174_v2, %v1106_v4 }
 0x17c   : > { %v1516_v38 = vand.u32 4294901760, %v1473_v20  ;;  %v1309_v56 = vadd.f32 %v1308_v31, %v1226_v30  ;;  %v1512_v60 = vand.u32 4294901760, %v1511_v13 }
 0x17e   : > { %v1358_v22 = vadd.f32 %v1357_v59, %v1309_v56  ;;  %1513 = vmatmul.f32.vlgmr.msrb.gmra.mxu0 %v1512_v60  ;;  %1602 = vmatmul.f32.gmra.mxu1 %v1516_v38  ;;  %v1517_v18 = vsub.f32 %v1473_v20, %v1516_v38 }
 0x180   : > { %v1446_v25 = vmul.f32 %v1442_v33, %v1358_v22  ;;  %1653 = vmatmul.f32.gmra.mxu2 %v1517_v18  ;;  %v1518_v10 = vand.u32 4294901760, %v1517_v18  ;;  %v1361_v26 = vpop.f32.mrf.mxu3 }
 0x181   : > { %v1231_v15 = vpop.f32.mrf.mxu1 }
 0x182   : > { %v1474_v42 = vmul.f32 %v1465_v46, %v1446_v25  ;;  %v1232_v12 = vadd.f32 %v1231_v15, %v1175_v63  ;;  %1700 = vmatmul.f32.gmra.mxu3 %v1518_v10  ;;  %v1312_v8 = vpop.f32.mrf.mxu2  ;;  %v1519_v35 = vsub.f32 %v1517_v18, %v1518_v10 }
 0x184   : > { %v1524_v23 = vand.u32 4294901760, %v1474_v42  ;;  %v1313_v19 = vadd.f32 %v1312_v8, %v1232_v12  ;;  %v1520_v3 = vand.u32 4294901760, %v1519_v35 }
 0x186   : > { %v1362_v41 = vadd.f32 %v1361_v26, %v1313_v19  ;;  %1521 = vmatmul.f32.gmra.mxu0 %v1520_v3  ;;  %1606 = vmatmul.f32.gmra.mxu1 %v1524_v23  ;;  %v1525_v52 = vsub.f32 %v1474_v42, %v1524_v23 }
 0x188   : > { %v1447_v47 = vmul.f32 %v1443_v17, %v1362_v41  ;;  %1658 = vmatmul.f32.gmra.mxu2 %v1525_v52  ;;  %v1526_v48 = vand.u32 4294901760, %v1525_v52 }
 0x18a   : > { %v1475_v45 = vmul.f32 %v1470_v0, %v1447_v47  ;;  %1706 = vmatmul.f32.gmra.mxu3 %v1526_v48  ;;  %v1527_v57 = vsub.f32 %v1525_v52, %v1526_v48 }
 0x18c   : > { %v1532_v1 = vand.u32 4294901760, %v1475_v45  ;;  %v1528_v62 = vand.u32 4294901760, %v1527_v57 }
 0x18e   : > { %1529 = vmatmul.f32.gmra.mxu0 %v1528_v62  ;;  %1610 = vmatmul.f32.gmra.mxu1 %v1532_v1  ;;  %v1533_v5 = vsub.f32 %v1475_v45, %v1532_v1 }
 0x190   : > { %1663 = vmatmul.f32.gmra.mxu2 %v1533_v5  ;;  %v1534_v7 = vand.u32 4294901760, %v1533_v5 }
 0x192   : > { %1712 = vmatmul.f32.gmra.mxu3 %v1534_v7  ;;  %v1535_v54 = vsub.f32 %v1533_v5, %v1534_v7 }
 0x194   : > { %v1536_v34 = vand.u32 4294901760, %v1535_v54 }
 0x196   : > { %1537 = vmatmul.f32.gmra.mxu0 %v1536_v34  ;;  %1798 = vmatmul.f32.vlgmr.msra.gmra.mxu1 %v2975_v27 }
 0x198   : > { %1765 = vmatmul.f32.vlgmr.msra.gmra.mxu2 %v1524_v23 }
 0x19a   : > { %1806 = vmatmul.f32.vlgmr.msra.gmra.mxu3 %v1524_v23 }
 0x19e   : > { %1757 = vmatmul.f32.vlgmr.msra.gmra.mxu0 %v2975_v27  ;;  %1802 = vmatmul.f32.gmra.mxu1 %v1516_v38 }
 0x1a0   : > { %1769 = vmatmul.f32.gmra.mxu2 %v1532_v1 }
 0x1a2   : > { %1810 = vmatmul.f32.gmra.mxu3 %v1532_v1 }
 0x1a6   : > { %1761 = vmatmul.f32.gmra.mxu0 %v1516_v38 }
 0x1f3   : > { %v1599_v49 = vpop.f32.mrf.mxu1 }
 0x1fb   : > { %v1514_v37 = vpop.f32.mrf.mxu0  ;;  %v1649_v32 = vpop.f32.mrf.mxu2 }
 0x1fc   : > { %v1603_v55 = vpop.f32.mrf.mxu1  ;;  %v1600_v50 = vadd.f32 %v1599_v49, %v1514_v37 }
 0x1fd   : > { %v1695_v58 = vpop.f32.mrf.mxu3 }
 0x1fe   : > { %v1650_v30 = vadd.f32 %v1649_v32, %v1600_v50 }
 0x200   : > { %v1696_v13 = vadd.f32 %v1695_v58, %v1650_v30 }
 0x203   : > { %v1522_v51 = vpop.f32.mrf.mxu0  ;;  %v1654_v6 = vpop.f32.mrf.mxu2 }
 0x204   : > { %v1607_v21 = vpop.f32.mrf.mxu1  ;;  %v1604_v29 = vadd.f32 %v1603_v55, %v1522_v51 }
 0x205   : > { %v1701_v9 = vpop.f32.mrf.mxu3 }
 0x206   : > { %v1655_v39 = vadd.f32 %v1654_v6, %v1604_v29 }
 0x208   : > { %v1702_v46 = vadd.f32 %v1701_v9, %v1655_v39 }
 0x20b   : > { %v1530_v36 = vpop.f32.mrf.mxu0  ;;  %v1659_v53 = vpop.f32.mrf.mxu2 }
 0x20c   : > { %v1611_v28 = vpop.f32.mrf.mxu1  ;;  %v1608_v43 = vadd.f32 %v1607_v21, %v1530_v36 }
 0x20d   : > { %v1707_v16 = vpop.f32.mrf.mxu3 }
 0x20e   : > { %v1660_v31 = vadd.f32 %v1659_v53, %v1608_v43 }
 0x210   : > { %v1708_v11 = vadd.f32 %v1707_v16, %v1660_v31 }
 0x213   : > { %v1538_v27 = vpop.f32.mrf.mxu0  ;;  %v1664_v59 = vpop.f32.mrf.mxu2 }
 0x214   : > { %v1612_v38 = vadd.f32 %v1611_v28, %v1538_v27  ;;  %v1799_v56 = vpop.f32.mrf.mxu1 }
 0x215   : > { %v1713_v20 = vpop.f32.mrf.mxu3 }
 0x216   : > { %v1665_v18 = vadd.f32 %v1664_v59, %v1612_v38 }
 0x218   : > { %v1714_v44 = vadd.f32 %v1713_v20, %v1665_v18 }
 0x21b   : > { %v1758_v60 = vpop.f32.mrf.mxu0  ;;  %v1766_v4 = vpop.f32.mrf.mxu2 }
 0x21c   : > { %v1759_v14 = vadd.f32 %v1758_v60, %v1696_v13  ;;  %v1767_v2 = vadd.f32 %v1766_v4, %v1708_v11  ;;  %v1803_v40 = vpop.f32.mrf.mxu1 }
 0x21d   : > { %v1807_v33 = vpop.f32.mrf.mxu3 }
 0x21e   : > { %v1800_v22 = vadd.f32 %v1799_v56, %v1759_v14  ;;  %v1808_v24 = vadd.f32 %v1807_v33, %v1767_v2 }
 0x220   : > { %1814 = vst.msk [vmem:[%s2112_s23] sm:$0xff] %vm371_vm0, %v1800_v22 }
 0x221   : > { %1816 = vst.msk [vmem:[%s2112_s23 + $0x10] sm:$0xff] %vm371_vm0, %v1808_v24 }
 0x223   : > { %v1762_v63 = vpop.f32.mrf.mxu0  ;;  %v1770_v10 = vpop.f32.mrf.mxu2 }
 0x224   : > { %v1763_v25 = vadd.f32 %v1762_v63, %v1702_v46  ;;  %v1771_v15 = vadd.f32 %v1770_v10, %v1714_v44 }
 0x225   : > { %v1811_v42 = vpop.f32.mrf.mxu3 }
 0x226   : > { %v1804_v12 = vadd.f32 %v1803_v40, %v1763_v25  ;;  %v1812_v8 = vadd.f32 %v1811_v42, %v1771_v15 }
 0x228   : > { %1815 = vst.msk [vmem:[%s2112_s23 + $0x8] sm:$0xff] %vm371_vm0, %v1804_v12 }
 0x229   : > { %1817 = vst.msk [vmem:[%s2112_s23 + $0x18] sm:$0xff] %vm371_vm0, %v1812_v8 }
 0x22a PF: > { %p1953_p8 = scmp.ne.s32.totalorder %s2097_s13, 0 }
 0x22c   : > { %1821 = sbr.rel (%p1953_p8) target bundleno = 566 (0x236), region = 48 }
 0x231   : > { %vm1822_vm2 = vcmask 523264   ;;  %v2042_v35 = vmov 0.0  }
 0x232   : > { %1823 = vst.msk [vmem:[%s2112_s23] sm:$0xff] %vm1822_vm2, %v2042_v35 }
 0x233   : > { %1824 = vst.msk [vmem:[%s2112_s23 + $0x8] sm:$0xff] %vm1822_vm2, %v2042_v35 }
 0x234   : > { %1825 = vst.msk [vmem:[%s2112_s23 + $0x10] sm:$0xff] %vm1822_vm2, %v2042_v35 }
 0x235   : > { %1826 = vst.msk [vmem:[%s2112_s23 + $0x18] sm:$0xff] %vm1822_vm2, %v2042_v35 }
 0x236 PF: > { %s30_s9 = sadd.s32 1, %s2037_s9  }
 0x237   : > { %p27_p9 = scmp.ge.s32.totalorder %s30_s9, 11  }
 0x239   :  { %29 = sbr.rel (!%p27_p9) target bundleno = 8 (0x8), region = 90 }

</bundles_post_ra>
